<compile_context>
chip_gen: v7x
topology: tpu7x:2x2x1
jax: 0.10.0
libtpu: 0.0.40
codegen_flags: <defaults>
</compile_context>

<pallas_src>
import functools

import jax
import jax.numpy as jnp
from jax import lax
from jax.experimental import pallas as pl
from jax.experimental.pallas import tpu as pltpu


# ------------------------------ tiling helpers ------------------------------

def _round_up(x, m):
    return ((x + m - 1) // m) * m


def _choose_tile(HW, W):
    """p-tile size (multiple of 128 dividing HW) and the slab sublane pad."""
    pad = _round_up(W + 1, 8)            # covers corner offsets {0, 1, W, W+1}
    if HW % 128 != 0:
        return HW, pad                   # single tile; block dim == full dim
    tp = 128
    while tp * 2 <= 512 and HW % (tp * 2) == 0 and HW // (tp * 2) >= 2:
        tp *= 2
    # Keep the extended slab <= ~8 MiB so slab + roll temporaries + IO buffers
    # stay comfortably inside v7x's 64 MiB VMEM (v5e/v6e have 128 MiB).
    while tp > 128 and (tp + pad) * HW * 4 > 8 * 1024 * 1024:
        tp //= 2
    return tp, pad


# --------------------------- in-kernel building blocks -----------------------

def _corner_terms(fl_ref, H, W):
    """Per-output-pixel corner index / OOB-masked bilinear weights.  (1, HW)."""
    HW = H * W
    flow = fl_ref[...]                        # (2, HW)
    u = flow[0:1, :]
    v = flow[1:2, :]

    q = lax.broadcasted_iota(jnp.int32, (1, HW), 1)
    if (W & (W - 1)) == 0:                    # avoid per-lane int div/mod
        gx = (q & (W - 1)).astype(jnp.float32)
        gy = (q >> (W.bit_length() - 1)).astype(jnp.float32)
    else:
        gx = (q % W).astype(jnp.float32)
        gy = (q // W).astype(jnp.float32)

    x = gx + u                                # align_corners=True => plain pixels
    y = gy + v

    x0f = jnp.floor(x)
    y0f = jnp.floor(y)
    x0 = x0f.astype(jnp.int32)
    y0 = y0f.astype(jnp.int32)

    wx1 = x - x0f
    wx0 = 1.0 - wx1
    wy1 = y - y0f
    wy0 = 1.0 - wy1

    inx0 = (x0 >= 0) & (x0 < W)
    inx1 = (x0 >= -1) & (x0 < W - 1)          # x1 = x0+1 in [0, W-1]
    iny0 = (y0 >= 0) & (y0 < H)
    iny1 = (y0 >= -1) & (y0 < H - 1)          # y1 = y0+1 in [0, H-1]

    w00 = jnp.where(inx0 & iny0, wx0 * wy0, 0.0)
    w10 = jnp.where(inx1 & iny0, wx1 * wy0, 0.0)
    w01 = jnp.where(inx0 & iny1, wx0 * wy1, 0.0)
    w11 = jnp.where(inx1 & iny1, wx1 * wy1, 0.0)

    idx00 = y0 * W + x0                       # may be <0 / >=HW; weights gate it
    wsum = w00 + w10 + w01 + w11              # == grid_sample(ones)
    return idx00, (w00, w10, w01, w11), wsum


def _build_slab(idx00, weights, p0, *, H, W, TP, PAD, use_rolls):
    """S_T slab: slab[p_local, q] = sum_k w_k(q) * [corner_k(q) == p0 + p_local]."""
    HW = H * W
    w00, w10, w01, w11 = weights
    if use_rolls:
        # One compare on a PAD-extended row range [p0 - PAD, p0 + TP), then the
        # 3 other corners via XLU sublane rolls (shifts 1, W, W+1).  Roll
        # wraparound rows land inside the pad and are discarded by the final
        # aligned slice; out-of-image corners have zero weight.
        TPE = TP + PAD
        r = lax.broadcasted_iota(jnp.int32, (TPE, HW), 0) + (p0 - PAD)
        e = jnp.where(r == idx00, 1.0, 0.0)              # (TPE, HW), <=1 hot/col
        acc = e * w00
        t = pltpu.roll(e, 1, 0)                          # corner (x1, y0)
        acc = acc + t * w10
        t = pltpu.roll(t, W - 1, 0)                      # corner (x0, y1)
        acc = acc + t * w01
        t = pltpu.roll(t, 1, 0)                          # corner (x1, y1)
        acc = acc + t * w11
        return acc[PAD:PAD + TP, :]                      # aligned sublane slice
    else:
        # Conservative build: 4 compares against the tile's p-iota.
        pi = lax.broadcasted_iota(jnp.int32, (TP, HW), 0) + p0
        slab = jnp.zeros((TP, HW), jnp.float32)
        for d, w in ((0, w00), (1, w10), (W, w01), (W + 1, w11)):
            slab = slab + jnp.where(pi == (idx00 + d), w, 0.0)
        return slab


# ------------------------------- Pallas kernels ------------------------------

def _gather_kernel(it_ref, i0_ref, fl_ref, g_ref, acc_ref, *,
                   H, W, TP, PAD, use_rolls, precision):
    """Pass 1: It0 = bilinear-sample(It) accumulated over p-tiles; emit g."""
    pt = pl.program_id(1)

    @pl.when(pt == 0)
    def _init():
        acc_ref[...] = jnp.zeros_like(acc_ref)

    idx00, weights, wsum = _corner_terms(fl_ref, H, W)
    slab = _build_slab(idx00, weights, pt * TP,
                       H=H, W=W, TP=TP, PAD=PAD, use_rolls=use_rolls)

    acc_ref[...] += jnp.dot(it_ref[...], slab,
                            preferred_element_type=jnp.float32,
                            precision=precision)

    @pl.when(pt == pl.num_programs(1) - 1)
    def _finalize():
        mask = (wsum >= 0.9999).astype(jnp.float32)      # (1, HW), binary
        g_ref[...] = (i0_ref[...] - acc_ref[...]) * mask


def _scatter_kernel(g_ref, fl_ref, out_ref, *, H, W, TP, PAD, use_rolls,
                    precision):
    """Pass 2: wg[:, tile] = sum_q g[:, q] * slab[p_local, q]  (scatter adjoint)."""
    idx00, weights, _ = _corner_terms(fl_ref, H, W)
    slab = _build_slab(idx00, weights, pl.program_id(1) * TP,
                       H=H, W=W, TP=TP, PAD=PAD, use_rolls=use_rolls)
    out_ref[...] = lax.dot_general(
        g_ref[...], slab,
        dimension_numbers=(((1,), (1,)), ((), ())),
        preferred_element_type=jnp.float32,
        precision=precision)


# --------------------------------- wrapper ----------------------------------

def fidelity_grad(It, I0, F0t, *, use_rolls=True,
                  precision=lax.Precision.HIGH):
    """Pallas equivalent of fidelityGradTorch.forward.  NCHW in / NCHW out."""
    N, C, H, W = It.shape
    HW = H * W
    it_f = It.reshape(N, C, HW).astype(jnp.float32)
    i0_f = I0.reshape(N, C, HW).astype(jnp.float32)
    fl_f = F0t.reshape(N, 2, HW).astype(jnp.float32)

    TP, PAD = _choose_tile(HW, W)
    NPT = HW // TP
    vmem_lim = 48 * 1024 * 1024        # explicit scoped-VMEM cap (v5e default ~16 MiB)

    # ---- pass 1: gather / residual g = (I0 - It0) * mask ----
    gather = pl.pallas_call(
        functools.partial(_gather_kernel, H=H, W=W, TP=TP, PAD=PAD,
                          use_rolls=use_rolls, precision=precision),
        out_shape=jax.ShapeDtypeStruct((N, C, HW), jnp.float32),
        grid_spec=pltpu.PrefetchScalarGridSpec(
            num_scalar_prefetch=0,
            grid=(N, NPT),
            in_specs=[
                pl.BlockSpec((None, C, TP), lambda n, p: (n, 0, p)),
                pl.BlockSpec((None, C, HW), lambda n, p: (n, 0, 0)),
                pl.BlockSpec((None, 2, HW), lambda n, p: (n, 0, 0)),
            ],
            out_specs=pl.BlockSpec((None, C, HW), lambda n, p: (n, 0, 0)),
            scratch_shapes=[pltpu.VMEM((C, HW), jnp.float32)],
        ),
        compiler_params=pltpu.CompilerParams(
            dimension_semantics=("parallel", "arbitrary"),
            vmem_limit_bytes=vmem_lim),
    )
    g = gather(it_f, i0_f, fl_f)

    # ---- pass 2: scatter-adjoint, independent lane-dense (C, TP) tiles ----
    scatter = pl.pallas_call(
        functools.partial(_scatter_kernel, H=H, W=W, TP=TP, PAD=PAD,
                          use_rolls=use_rolls, precision=precision),
        out_shape=jax.ShapeDtypeStruct((N, C, HW), jnp.float32),
        grid_spec=pltpu.PrefetchScalarGridSpec(
            num_scalar_prefetch=0,
            grid=(N, NPT),
            in_specs=[
                pl.BlockSpec((None, C, HW), lambda n, p: (n, 0, 0)),
                pl.BlockSpec((None, 2, HW), lambda n, p: (n, 0, 0)),
            ],
            out_specs=pl.BlockSpec((None, C, TP), lambda n, p: (n, 0, p)),
        ),
        compiler_params=pltpu.CompilerParams(
            dimension_semantics=("parallel", "parallel"),
            vmem_limit_bytes=vmem_lim),
    )
    wg = scatter(g, fl_f)
    return wg.reshape(N, C, H, W)


# ----------------------------- pure-JAX reference ----------------------------

def _backwarp_ref(img, flow):
    N, C, H, W = img.shape
    u = flow[:, 0]
    v = flow[:, 1]
    gy, gx = jnp.meshgrid(jnp.arange(H), jnp.arange(W), indexing="ij")
    x = gx[None].astype(jnp.float32) + u
    y = gy[None].astype(jnp.float32) + v

    x0 = jnp.floor(x); x1 = x0 + 1
    y0 = jnp.floor(y); y1 = y0 + 1

    def gather(im, ix, iy):
        inb = (ix >= 0) & (ix <= W - 1) & (iy >= 0) & (iy <= H - 1)
        ixc = jnp.clip(ix, 0, W - 1).astype(jnp.int32)
        iyc = jnp.clip(iy, 0, H - 1).astype(jnp.int32)
        idx = (iyc * W + ixc).reshape(N, 1, H * W)
        idx = jnp.broadcast_to(idx, (N, C, H * W))
        vals = jnp.take_along_axis(im.reshape(N, C, H * W), idx, axis=2)
        return vals.reshape(N, C, H, W) * inb[:, None].astype(im.dtype)

    w00 = ((x1 - x) * (y1 - y))[:, None]
    w10 = ((x - x0) * (y1 - y))[:, None]
    w01 = ((x1 - x) * (y - y0))[:, None]
    w11 = ((x - x0) * (y - y0))[:, None]

    def sample(im):
        return (w00 * gather(im, x0, y0) + w10 * gather(im, x1, y0)
                + w01 * gather(im, x0, y1) + w11 * gather(im, x1, y1))

    out = sample(img)
    mask = sample(jnp.ones_like(img))
    mask = jnp.where(mask < 0.9999, 0.0, 1.0)
    return out * mask, mask


def fidelity_grad_ref(It, I0, F0t):
    def loss_fn(It_):
        It0m, mask = _backwarp_ref(It_, F0t)
        mask = lax.stop_gradient(mask)
        return -(0.5 * (I0 * mask - It0m * mask) ** 2).sum()
    return jax.grad(loss_fn)(It)


# ----------------------------------- main ------------------------------------

if __name__ == "__main__":
    key = jax.random.PRNGKey(0)
    k1, k2, k3 = jax.random.split(key, 3)
    It = jax.random.normal(k1, (2, 4, 16, 16), jnp.float32)
    I0 = jax.random.normal(k2, (2, 4, 16, 16), jnp.float32)
    F0t = jax.random.normal(k3, (2, 2, 16, 16), jnp.float32) * 2.0

    ref = fidelity_grad_ref(It, I0, F0t)
    jax.block_until_ready(ref)

    tol = 1e-3
    try:
        out = fidelity_grad(It, I0, F0t)
        jax.block_until_ready(out)
        err = float(jnp.max(jnp.abs(out - ref)))
    except Exception:
        err = float("inf")
    if not err < tol:
        # Conservative path (4-compare slab build, HIGHEST matmul precision),
        # still fully p-tiled, in case the roll/HIGH-precision path misbehaves
        # on a given generation.
        out = fidelity_grad(It, I0, F0t, use_rolls=False,
                            precision=lax.Precision.HIGHEST)
        jax.block_until_ready(out)
        err = float(jnp.max(jnp.abs(out - ref)))

    assert err < tol, f"max abs error {err}"
    print("KERNEL_OK")
</pallas_src>

<mosaic_0001>
module attributes {stable_mosaic.version = 11 : i64} {
  func.func @_gather_kernel(%arg0: i32, %arg1: i32, %arg2: memref<1x4x128xf32, #tpu.memory_space<vmem>>, %arg3: memref<1x4x256xf32, #tpu.memory_space<vmem>>, %arg4: memref<1x2x256xf32, #tpu.memory_space<vmem>>, %arg5: memref<1x4x256xf32, #tpu.memory_space<vmem>>, %arg6: memref<4x256xf32, #tpu.memory_space<vmem>>) attributes {dimension_semantics = [#tpu.dimension_semantics<parallel>, #tpu.dimension_semantics<arbitrary>], iteration_bounds = array<i64: 2, 2>, scalar_prefetch = 0 : i64, scratch_operands = 1 : i64, tpu.core_type = #tpu.core_type<tc>, window_params = [{transform_indices = @transform_0, window_bounds = array<i64: 1, 4, 128>}, {transform_indices = @transform_1, window_bounds = array<i64: 1, 4, 256>}, {transform_indices = @transform_2, window_bounds = array<i64: 1, 2, 256>}, {transform_indices = @transform_3, window_bounds = array<i64: 1, 4, 256>}]} {
    %c0_i32 = arith.constant 0 : i32
    %0 = arith.cmpi eq, %arg1, %c0_i32 : i32
    %1 = arith.extui %0 : i1 to i32
    %c0_i32_0 = arith.constant 0 : i32
    %2 = arith.cmpi ne, %1, %c0_i32_0 : i32
    scf.if %2 {
      %cst_32 = arith.constant 0.000000e+00 : f32
      %118 = vector.broadcast %cst_32 : f32 to vector<4x256xf32>
      %c0_33 = arith.constant 0 : index
      %c0_34 = arith.constant 0 : index
      %119 = vector.load %arg6[%c0_33, %c0_34] : memref<4x256xf32, #tpu.memory_space<vmem>>, vector<4x256xf32>
      tpu.vector_store %arg6[%c0_33, %c0_34], %118 {strides = array<i32>} : memref<4x256xf32, #tpu.memory_space<vmem>>, vector<4x256xf32>,
    } else {
    }
    %c0 = arith.constant 0 : index
    %c0_1 = arith.constant 0 : index
    %c0_2 = arith.constant 0 : index
    %3 = vector.load %arg4[%c0, %c0_1, %c0_2] : memref<1x2x256xf32, #tpu.memory_space<vmem>>, vector<1x2x256xf32>
    %4 = vector.shape_cast %3 : vector<1x2x256xf32> to vector<2x256xf32>
    %5 = vector.extract_strided_slice %4 {offsets = [0, 0], sizes = [1, 256], strides = [1, 1]} : vector<2x256xf32> to vector<1x256xf32>
    %6 = vector.extract_strided_slice %4 {offsets = [1, 0], sizes = [1, 256], strides = [1, 1]} : vector<2x256xf32> to vector<1x256xf32>
    %7 = tpu.iota {dimensions = array<i32: 1>} : vector<1x256xi32>
    %c15_i32 = arith.constant 15 : i32
    %8 = vector.broadcast %c15_i32 : i32 to vector<1x256xi32>
    %9 = arith.andi %7, %8 : vector<1x256xi32>
    %10 = arith.sitofp %9 : vector<1x256xi32> to vector<1x256xf32>
    %c4_i32 = arith.constant 4 : i32
    %11 = vector.broadcast %c4_i32 : i32 to vector<1x256xi32>
    %12 = arith.shrsi %7, %11 : vector<1x256xi32>
    %13 = arith.sitofp %12 : vector<1x256xi32> to vector<1x256xf32>
    %14 = arith.addf %10, %5 : vector<1x256xf32>
    %15 = arith.addf %13, %6 : vector<1x256xf32>
    %16 = math.floor %14 : vector<1x256xf32>
    %17 = math.floor %15 : vector<1x256xf32>
    %18 = arith.fptosi %16 : vector<1x256xf32> to vector<1x256xi32>
    %19 = arith.fptosi %17 : vector<1x256xf32> to vector<1x256xi32>
    %20 = arith.subf %14, %16 : vector<1x256xf32>
    %cst = arith.constant 1.000000e+00 : f32
    %21 = vector.broadcast %cst : f32 to vector<1x256xf32>
    %22 = arith.subf %21, %20 : vector<1x256xf32>
    %23 = arith.subf %15, %17 : vector<1x256xf32>
    %cst_3 = arith.constant 1.000000e+00 : f32
    %24 = vector.broadcast %cst_3 : f32 to vector<1x256xf32>
    %25 = arith.subf %24, %23 : vector<1x256xf32>
    %c0_i32_4 = arith.constant 0 : i32
    %26 = vector.broadcast %c0_i32_4 : i32 to vector<1x256xi32>
    %27 = arith.cmpi sge, %18, %26 : vector<1x256xi32>
    %c16_i32 = arith.constant 16 : i32
    %28 = vector.broadcast %c16_i32 : i32 to vector<1x256xi32>
    %29 = arith.cmpi slt, %18, %28 : vector<1x256xi32>
    %30 = arith.andi %27, %29 : vector<1x256xi1>
    %c-1_i32 = arith.constant -1 : i32
    %31 = vector.broadcast %c-1_i32 : i32 to vector<1x256xi32>
    %32 = arith.cmpi sge, %18, %31 : vector<1x256xi32>
    %c15_i32_5 = arith.constant 15 : i32
    %33 = vector.broadcast %c15_i32_5 : i32 to vector<1x256xi32>
    %34 = arith.cmpi slt, %18, %33 : vector<1x256xi32>
    %35 = arith.andi %32, %34 : vector<1x256xi1>
    %c0_i32_6 = arith.constant 0 : i32
    %36 = vector.broadcast %c0_i32_6 : i32 to vector<1x256xi32>
    %37 = arith.cmpi sge, %19, %36 : vector<1x256xi32>
    %c16_i32_7 = arith.constant 16 : i32
    %38 = vector.broadcast %c16_i32_7 : i32 to vector<1x256xi32>
    %39 = arith.cmpi slt, %19, %38 : vector<1x256xi32>
    %40 = arith.andi %37, %39 : vector<1x256xi1>
    %c-1_i32_8 = arith.constant -1 : i32
    %41 = vector.broadcast %c-1_i32_8 : i32 to vector<1x256xi32>
    %42 = arith.cmpi sge, %19, %41 : vector<1x256xi32>
    %c15_i32_9 = arith.constant 15 : i32
    %43 = vector.broadcast %c15_i32_9 : i32 to vector<1x256xi32>
    %44 = arith.cmpi slt, %19, %43 : vector<1x256xi32>
    %45 = arith.andi %42, %44 : vector<1x256xi1>
    %46 = arith.andi %30, %40 : vector<1x256xi1>
    %47 = arith.mulf %22, %25 : vector<1x256xf32>
    %cst_10 = arith.constant 0.000000e+00 : f32
    %48 = vector.broadcast %cst_10 : f32 to vector<1x256xf32>
    %49 = arith.select %46, %47, %48 : vector<1x256xi1>, vector<1x256xf32>
    %50 = arith.andi %35, %40 : vector<1x256xi1>
    %51 = arith.mulf %20, %25 : vector<1x256xf32>
    %cst_11 = arith.constant 0.000000e+00 : f32
    %52 = vector.broadcast %cst_11 : f32 to vector<1x256xf32>
    %53 = arith.select %50, %51, %52 : vector<1x256xi1>, vector<1x256xf32>
    %54 = arith.andi %30, %45 : vector<1x256xi1>
    %55 = arith.mulf %22, %23 : vector<1x256xf32>
    %cst_12 = arith.constant 0.000000e+00 : f32
    %56 = vector.broadcast %cst_12 : f32 to vector<1x256xf32>
    %57 = arith.select %54, %55, %56 : vector<1x256xi1>, vector<1x256xf32>
    %58 = arith.andi %35, %45 : vector<1x256xi1>
    %59 = arith.mulf %20, %23 : vector<1x256xf32>
    %cst_13 = arith.constant 0.000000e+00 : f32
    %60 = vector.broadcast %cst_13 : f32 to vector<1x256xf32>
    %61 = arith.select %58, %59, %60 : vector<1x256xi1>, vector<1x256xf32>
    %c16_i32_14 = arith.constant 16 : i32
    %62 = vector.broadcast %c16_i32_14 : i32 to vector<1x256xi32>
    %63 = arith.muli %19, %62 : vector<1x256xi32>
    %64 = arith.addi %63, %18 : vector<1x256xi32>
    %65 = arith.addf %49, %53 : vector<1x256xf32>
    %66 = arith.addf %65, %57 : vector<1x256xf32>
    %67 = arith.addf %66, %61 : vector<1x256xf32>
    %c128_i32 = arith.constant 128 : i32
    %68 = arith.muli %arg1, %c128_i32 : i32
    %69 = tpu.iota {dimensions = array<i32: 0>} : vector<128x256xi32>
    %70 = vector.broadcast %68 : i32 to vector<128x256xi32>
    %71 = arith.addi %69, %70 : vector<128x256xi32>
    %cst_15 = arith.constant 0.000000e+00 : f32
    %72 = vector.broadcast %cst_15 : f32 to vector<128x256xf32>
    %c0_i32_16 = arith.constant 0 : i32
    %73 = vector.broadcast %c0_i32_16 : i32 to vector<1x256xi32>
    %74 = arith.addi %64, %73 : vector<1x256xi32>
    %75 = vector.broadcast %74 : vector<1x256xi32> to vector<128x256xi32>
    %76 = arith.cmpi eq, %71, %75 : vector<128x256xi32>
    %cst_17 = arith.constant 0.000000e+00 : f32
    %77 = vector.shape_cast %49 : vector<1x256xf32> to vector<1x256xf32>
    %78 = vector.broadcast %77 : vector<1x256xf32> to vector<128x256xf32>
    %79 = vector.broadcast %cst_17 : f32 to vector<128x256xf32>
    %80 = arith.select %76, %78, %79 : vector<128x256xi1>, vector<128x256xf32>
    %81 = arith.addf %72, %80 : vector<128x256xf32>
    %c1_i32 = arith.constant 1 : i32
    %82 = vector.broadcast %c1_i32 : i32 to vector<1x256xi32>
    %83 = arith.addi %64, %82 : vector<1x256xi32>
    %84 = vector.broadcast %83 : vector<1x256xi32> to vector<128x256xi32>
    %85 = arith.cmpi eq, %71, %84 : vector<128x256xi32>
    %cst_18 = arith.constant 0.000000e+00 : f32
    %86 = vector.shape_cast %53 : vector<1x256xf32> to vector<1x256xf32>
    %87 = vector.broadcast %86 : vector<1x256xf32> to vector<128x256xf32>
    %88 = vector.broadcast %cst_18 : f32 to vector<128x256xf32>
    %89 = arith.select %85, %87, %88 : vector<128x256xi1>, vector<128x256xf32>
    %90 = arith.addf %81, %89 : vector<128x256xf32>
    %c16_i32_19 = arith.constant 16 : i32
    %91 = vector.broadcast %c16_i32_19 : i32 to vector<1x256xi32>
    %92 = arith.addi %64, %91 : vector<1x256xi32>
    %93 = vector.broadcast %92 : vector<1x256xi32> to vector<128x256xi32>
    %94 = arith.cmpi eq, %71, %93 : vector<128x256xi32>
    %cst_20 = arith.constant 0.000000e+00 : f32
    %95 = vector.shape_cast %57 : vector<1x256xf32> to vector<1x256xf32>
    %96 = vector.broadcast %95 : vector<1x256xf32> to vector<128x256xf32>
    %97 = vector.broadcast %cst_20 : f32 to vector<128x256xf32>
    %98 = arith.select %94, %96, %97 : vector<128x256xi1>, vector<128x256xf32>
    %99 = arith.addf %90, %98 : vector<128x256xf32>
    %c17_i32 = arith.constant 17 : i32
    %100 = vector.broadcast %c17_i32 : i32 to vector<1x256xi32>
    %101 = arith.addi %64, %100 : vector<1x256xi32>
    %102 = vector.broadcast %101 : vector<1x256xi32> to vector<128x256xi32>
    %103 = arith.cmpi eq, %71, %102 : vector<128x256xi32>
    %cst_21 = arith.constant 0.000000e+00 : f32
    %104 = vector.shape_cast %61 : vector<1x256xf32> to vector<1x256xf32>
    %105 = vector.broadcast %104 : vector<1x256xf32> to vector<128x256xf32>
    %106 = vector.broadcast %cst_21 : f32 to vector<128x256xf32>
    %107 = arith.select %103, %105, %106 : vector<128x256xi1>, vector<128x256xf32>
    %108 = arith.addf %99, %107 : vector<128x256xf32>
    %c0_22 = arith.constant 0 : index
    %c0_23 = arith.constant 0 : index
    %109 = vector.load %arg6[%c0_22, %c0_23] : memref<4x256xf32, #tpu.memory_space<vmem>>, vector<4x256xf32>
    %c0_24 = arith.constant 0 : index
    %c0_25 = arith.constant 0 : index
    %c0_26 = arith.constant 0 : index
    %110 = vector.load %arg2[%c0_24, %c0_25, %c0_26] : memref<1x4x128xf32, #tpu.memory_space<vmem>>, vector<1x4x128xf32>
    %111 = vector.shape_cast %110 : vector<1x4x128xf32> to vector<4x128xf32>
    %cst_27 = arith.constant dense<0.000000e+00> : vector<4x256xf32>
    %112 = tpu.matmul %111, %108, %cst_27 {dimension_numbers = #tpu.dot_dimension_numbers<[1], [0], [0], [1], [0, 0, 1, 1], [], []>, precision = #tpu.contract_precision<fp32>} : vector<4x128xf32>, vector<128x256xf32>, vector<4x256xf32> -> vector<4x256xf32>
    %113 = arith.addf %109, %112 : vector<4x256xf32>
    %c0_28 = arith.constant 0 : index
    %c0_29 = arith.constant 0 : index
    %114 = vector.load %arg6[%c0_28, %c0_29] : memref<4x256xf32, #tpu.memory_space<vmem>>, vector<4x256xf32>
    tpu.vector_store %arg6[%c0_28, %c0_29], %113 {strides = array<i32>} : memref<4x256xf32, #tpu.memory_space<vmem>>, vector<4x256xf32>,
    %c1_i32_30 = arith.constant 1 : i32
    %115 = arith.cmpi eq, %arg1, %c1_i32_30 : i32
    %116 = arith.extui %115 : i1 to i32
    %c0_i32_31 = arith.constant 0 : i32
    %117 = arith.cmpi ne, %116, %c0_i32_31 : i32
    scf.if %117 {
      %cst_32 = arith.constant 0.999899983 : f32
      %118 = vector.broadcast %cst_32 : f32 to vector<1x256xf32>
      %119 = arith.cmpf oge, %67, %118 : vector<1x256xf32>
      %120 = arith.extui %119 : vector<1x256xi1> to vector<1x256xi32>
      %121 = arith.sitofp %120 : vector<1x256xi32> to vector<1x256xf32>
      %c0_33 = arith.constant 0 : index
      %c0_34 = arith.constant 0 : index
      %c0_35 = arith.constant 0 : index
      %122 = vector.load %arg3[%c0_33, %c0_34, %c0_35] : memref<1x4x256xf32, #tpu.memory_space<vmem>>, vector<1x4x256xf32>
      %123 = vector.shape_cast %122 : vector<1x4x256xf32> to vector<4x256xf32>
      %c0_36 = arith.constant 0 : index
      %c0_37 = arith.constant 0 : index
      %124 = vector.load %arg6[%c0_36, %c0_37] : memref<4x256xf32, #tpu.memory_space<vmem>>, vector<4x256xf32>
      %125 = arith.subf %123, %124 : vector<4x256xf32>
      %126 = vector.broadcast %121 : vector<1x256xf32> to vector<4x256xf32>
      %127 = arith.mulf %125, %126 : vector<4x256xf32>
      %c0_38 = arith.constant 0 : index
      %c0_39 = arith.constant 0 : index
      %c0_40 = arith.constant 0 : index
      %128 = vector.load %arg5[%c0_38, %c0_39, %c0_40] : memref<1x4x256xf32, #tpu.memory_space<vmem>>, vector<1x4x256xf32>
      %129 = vector.shape_cast %128 : vector<1x4x256xf32> to vector<4x256xf32>
      %130 = vector.shape_cast %127 : vector<4x256xf32> to vector<1x4x256xf32>
      tpu.vector_store %arg5[%c0_38, %c0_39, %c0_40], %130 {strides = array<i32>} : memref<1x4x256xf32, #tpu.memory_space<vmem>>, vector<1x4x256xf32>,
    } else {
    }
    return
  }
  func.func @transform_0(%arg0: i32, %arg1: i32) -> (i32, i32, i32) {
    %c0_i32 = arith.constant 0 : i32
    %c0_i32_0 = arith.constant 0 : i32
    return %arg0, %c0_i32, %arg1 : i32, i32, i32
  }
  func.func @transform_1(%arg0: i32, %arg1: i32) -> (i32, i32, i32) {
    %c0_i32 = arith.constant 0 : i32
    %c0_i32_0 = arith.constant 0 : i32
    %c0_i32_1 = arith.constant 0 : i32
    return %arg0, %c0_i32, %c0_i32_0 : i32, i32, i32
  }
  func.func @transform_2(%arg0: i32, %arg1: i32) -> (i32, i32, i32) {
    %c0_i32 = arith.constant 0 : i32
    %c0_i32_0 = arith.constant 0 : i32
    %c0_i32_1 = arith.constant 0 : i32
    return %arg0, %c0_i32, %c0_i32_0 : i32, i32, i32
  }
  func.func @transform_3(%arg0: i32, %arg1: i32) -> (i32, i32, i32) {
    %c0_i32 = arith.constant 0 : i32
    %c0_i32_0 = arith.constant 0 : i32
    %c0_i32_1 = arith.constant 0 : i32
    return %arg0, %c0_i32, %c0_i32_0 : i32, i32, i32
  }
}

</mosaic_0001>

<bundles_post_ra>
// kernel: tpu_custom_call.1
= control target key start
LH: loop header
LB: loop body
LE: loop exit
PB: predicated region body
PF: predicated region fallthrough
CT: control target
= control target key end

     0   :  { %s3690_s0 = inlined_call_operand.hbm [shape: f32[2,4,256], index: 0, kind: input, shape index: {}]   ;;  %s3691_s1 = inlined_call_operand.hbm [shape: f32[2,4,256], index: 1, kind: input, shape index: {}]   ;;  %s3692_s2 = inlined_call_operand.hbm [shape: f32[2,2,256], index: 2, kind: input, shape index: {}]   ;;  %s3693_s3 = inlined_call_operand.hbm [shape: f32[2,4,256], index: 3, kind: output, shape index: {}]  }
   0x1   :  { %3729 = sst [smem:[#allocation37_spill]] %s3691_s1 }
   0x2   :  { %3730 = sst [smem:[#allocation38_spill]] %s3693_s3 }
   0x3   :  { %8 = vsyncpa [#allocation4], 0 }
   0x4   :  { %10 = vsyncpa [#allocation4 + $0x1], 0 }
   0x5   :  { %11 = vsyncpa [#allocation7], 0 }
   0x6   :  { %13 = vsyncpa [#allocation7 + $0x1], 0 }
   0x7   :  { %14 = vsyncpa [#allocation5], 0 }
   0x8   :  { %16 = vsyncpa [#allocation5 + $0x1], 0  ;;  %s2512_s12 = smov 0   ;;  %s2514_s13 = smov 0  }
   0x9   :  { %s2516_s14 = smov 0   ;;  %s2518_s15 = smov 0  }
   0xa   :  { %s2520_s16 = smov 0   ;;  %s2522_s17 = smov 0  }
   0xb   :  { %s2524_s18 = smov 0   ;;  %s2526_s19 = smov 0  }
   0xc   :  { %s2528_s20 = smov 0   ;;  %s2530_s21 = smov 0  }
   0xd   :  { %s2532_s22 = smov 0  }
   0xe LB: > { %3731 = sst [smem:[#allocation13_spill]] %s2443_s12  ;;  %s2568_s23 = sadd.s32 4294967295, %s2483_s22   ;;  %s2483_s22 = sphi %s2532_s22, %s22_s22   ;;  %s2479_s21 = sphi %s2530_s21, %s3834_s21   ;;  %s2475_s20 = sphi %s2528_s20, %s3833_s20   ;;  %s2471_s19 = sphi %s2526_s19, %s3832_s19   ;;  %s2467_s18 = sphi %s2524_s18, %s3831_s18   ;;  %s2463_s17 = sphi %s2522_s17, %s3830_s17   ;;  %s2459_s16 = sphi %s2520_s16, %s3829_s16   ;;  %s2455_s15 = sphi %s2518_s15, %s3828_s15   ;;  %s2451_s14 = sphi %s2516_s14, %s3827_s14   ;;  %s2447_s13 = sphi %s2514_s13, %s3826_s13   ;;  %s2443_s12 = sphi %s2512_s12, %s3824_s12  }
   0xf   : > { %3732 = sst [smem:[#allocation14_spill]] %s2447_s13  ;;  %s1912_s24 = sadd.s32 4294967294, %s2483_s22  }
  0x10   : > { %3733 = sst [smem:[#allocation15_spill]] %s2467_s18  ;;  %p3697_p0 = scmp.eq.s32.totalorder %s2483_s22, 0 }
  0x11   : > { %3734 = sst [smem:[#allocation16_spill]] %s2471_s19  ;;  %p3696_p1 = scmp.eq.s32.totalorder %s2568_s23, 0 }
  0x12   : > { %3735 = sst [smem:[#allocation17_spill]] %s2568_s23  ;;  %p76_p2 = scmp.ne.s32.totalorder %s2451_s14, %s2447_s13 }
  0x13   : > { %p82_p3 = scmp.ne.s32.totalorder %s2447_s13, %s2443_s12  ;;  %p132_p4 = scmp.eq.s32.totalorder %s2568_s23, 3 }
  0x14   : > { %p2581_p5 = por %p76_p2, %p3697_p0  ;;  %p138_p6 = scmp.eq.s32.totalorder %s1912_s24, 3 }
  0x15   : > { %p2587_p7 = por %p82_p3, %p3696_p1  ;;  %p2591_p8 = por %p132_p4, %p76_p2 }
  0x16   : > { %p2595_p9 = por %p138_p6, %p82_p3  ;;  %p3695_p10 = scmp.lt.s32.totalorder %s2483_s22, 4 }
  0x17   : > { %s3737_s27 = scalar_select %p2587_p7, 1, 0 }
  0x18   : > { %s3739_s28 = scalar_select %p2591_p8, 1, 0 }
  0x19   : > { %3738 = sst [smem:[#allocation18_spill]] %s3737_s27  ;;  %s178_s30 = sand.u32 1, %s2483_s22  }
  0x1a   : > { %3740 = sst [smem:[#allocation19_spill]] %s3739_s28  ;;  %s180_s4 = sand.u32 1, %s2451_s14  }
  0x1b   : > { %s3741_s29 = scalar_select %p2595_p9, 1, 0 }
  0x1c   : > { %s1918_s5 = sshll.u32 %s180_s4, 3  ;;  %s1939_s6 = sshll.u32 %s2479_s21, 7 }
  0x1d   : > { %3742 = sst [smem:[#allocation20_spill]] %s3741_s29  ;;  %s3743_s1 = sld [smem:[#allocation37_spill]] }
  0x1e   : > { %s182_s10 = scalar_lea.vmem [#allocation6], %s1918_s5  ;;  %p2612_p11 = pnand %p3695_p10, %p2581_p5 }
  0x1f   : > { %s190_s11 = sshll.u32 %s182_s10, 4  ;;  %s2618_s25 = sshll.u32 %s180_s4, 2  ;;  %s2616_s11 = int_to_ptr.vmem [resolvable:$true] %s190_s11 }
  0x20   : > { %p3711_p2 = pneg %p2612_p11 }
  0x23   : > { %s2606_s9 = scalar_lea.hbm %s3743_s1, %s1939_s6  ;;  %s2621_s6 = scalar_lea.sflag [#allocation7], %s178_s30 }
  0x24   : > { %s2267_s7 = scalar_lea.hbm %s2606_s9, 128  ;;  %s2272_s8 = scalar_lea.hbm %s3743_s1, 256 }
  0x25   : > { %p2268_p13 = scmp.ne.s32.totalorder %s2606_s9, %s2267_s7  ;;  %p2273_p5 = scmp.lt.u32.totalorder %s2606_s9, %s3743_s1 }
  0x26   : > { %p2274_p6 = scmp.lt.u32.totalorder %s2272_s8, %s2267_s7  ;;  %p2276_p1 = scmp.lt.u32.totalorder %s2267_s7, %s2606_s9 }
  0x27   : > { %p2270_p3 = pnand %p3711_p2, %p2268_p13 }
  0x28   : > { %p2275_p10 = por %p2274_p6, %p2273_p5 }
  0x29   : > { %p2271_p4 = pneg %p2270_p3 }
  0x2a   : > { %p2277_p0 = por %p2276_p1, %p2275_p10 }
  0x2c   : > { %p2278_p12 = pnand %p2277_p0, %p2271_p4 }
  0x2e   : > { %2281 = shalt.err (!%p2278_p12)
}
  0x2f   : > { %s2282_s30 = scalar_lea.vmem %s2616_s11, 128  ;;  %s2485_s4 = smov [#allocation6]  }
  0x30   : > { %p2283_p13 = scmp.ne.s32.totalorder %s2616_s11, %s2282_s30  ;;  %s2287_s26 = sshll.u32 %s2485_s4, 4  ;;  %s2288_s26 = int_to_ptr.vmem [resolvable:$false] %s2287_s26 }
  0x31   : > { %s2289_s29 = scalar_lea.vmem %s2288_s26, 256  ;;  %p2290_p8 = scmp.lt.s32.totalorder %s2616_s11, %s2288_s26 }
  0x32   : > { %p2285_p3 = pnand %p2283_p13, %p3711_p2  ;;  %p2291_p5 = scmp.lt.s32.totalorder %s2289_s29, %s2282_s30 }
  0x34   : > { %p2286_p9 = pneg %p2285_p3  ;;  %p2292_p6 = por %p2291_p5, %p2290_p8 }
  0x36   : > { %p2293_p1 = pnand %p2292_p6, %p2286_p9 }
  0x38   : > { %2296 = shalt.err (!%p2293_p1)
}
  0x39   : > { %2166 = dma.hbm_to_vmem [thread:$0]  (!%p2612_p11), %s2606_s9, 128, %s2616_s11, %s2621_s6  }
  0x3a   : > { %p214_p0 = scmp.lt.s32.totalorder %s2483_s22, 5  ;;  %p3745_p8 = scmp.ge.s32.totalorder %s2483_s22, 1 }
  0x3b   : > { %s31_s5 = sadd.s32 1, %s2475_s20  ;;  %s34_s8 = sadd.s32 1, %s2479_s21 }
  0x3c   : > { %p2652_p9 = pnand %p3745_p8, %p214_p0  ;;  %p32_p10 = scmp.ge.s32.totalorder %s31_s5, 2 }
  0x3d   : > { %s43_s10 = sadd.s32 1, %s2463_s17  ;;  %p50_p12 = scmp.ne.s32.totalorder %s2463_s17, %s2459_s16 }
  0x3e   : > { %s3746_s7 = scalar_select %p2652_p9, 1, 0 }
  0x3f   : > { %p56_p4 = scmp.ne.s32.totalorder %s2459_s16, %s2455_s15  ;;  %s3836_s5 = smov (%p32_p10, %s31_s5), 0 }
  0x40   : > { %3747 = sst [smem:[#allocation21_spill]] %s3836_s5  ;;  %s3838_s8 = smov (!%p32_p10, %s34_s8), %s2479_s21 }
  0x41   : > { %s39_s9 = ssub.s32 %s2475_s20, %s3836_s5  ;;  %p3748_p13 = scmp.eq.s32.totalorder %s2483_s22, 0 }
  0x42   : > { %p36_p5 = scmp.ge.s32.totalorder %s3838_s8, 2  ;;  %p3750_p6 = scmp.eq.s32.totalorder %s2568_s23, 0 }
  0x43   : > { %p2670_p3 = por %p3748_p13, %p50_p12  ;;  %s158_s15 = sand.u32 1, %s2463_s17  }
  0x44   : > { %p2676_p1 = por %p3750_p6, %p56_p4  ;;  %s1916_s4 = sshll.u32 %s2479_s21, 1 }
  0x45   : > { %s3840_s8 = smov (%p36_p5, %s3838_s8), 0  ;;  %s1915_s26 = sshll.u32 %s158_s15, 2 }
  0x46   : > { %s3751_s30 = scalar_select %p2676_p1, 1, 0 }
  0x47   : > { %s38_s29 = ssub.s32 %s2479_s21, %s3840_s8  ;;  %s167_s5 = sadd.s32 %s2475_s20, %s1916_s4 }
  0x48   : > { %3752 = sst [smem:[#allocation22_spill]] %s3751_s30  ;;  %s40_s1 = sor.u32 %s39_s9, %s38_s29 }
  0x49   : > { %p67_p0 = scmp.eq.s32.totalorder %s38_s29, 0  ;;  %p41_p8 = scmp.eq.s32.totalorder %s40_s1, 0 }
  0x4a   : > { %s3753_s12 = sadd.s32 1, %s2451_s14  ;;  %s1917_s19 = sshll.u32 %s167_s5, 6 }
  0x4b   : > { %s2690_s3 = scalar_select %p67_p0, %s2451_s14, %s3753_s12  }
  0x4c   : > { %s2693_s28 = scalar_select %p41_p8, %s2463_s17, %s43_s10  }
  0x4d   : > { %s162_s18 = scalar_lea.vmem [#allocation3], %s1915_s26  ;;  %s2698_s30 = scalar_lea.hbm %s3690_s0, %s1917_s19 }
  0x4e   : > { %s171_s27 = sshll.u32 %s162_s18, 4  ;;  %p3754_p10 = scmp.lt.s32.totalorder %s2483_s22, 4  ;;  %s2700_s27 = int_to_ptr.vmem [resolvable:$true] %s171_s27 }
  0x4f   : > { %s1940_s12 = sshll.u32 %s2479_s21, 6  ;;  %s201_s18 = scalar_lea.vmem [#allocation8], %s2618_s25 }
  0x50   : > { %p2706_p12 = pnand %p3754_p10, %p2670_p3  ;;  %s2712_s5 = sshll.u32 %s201_s18, 4  ;;  %s210_s5 = int_to_ptr.vmem [resolvable:$true] %s2712_s5 }
  0x51   : > { %s2717_s23 = scalar_lea.hbm %s3692_s2, %s1940_s12  ;;  %s159_s10 = scalar_lea.sflag [#allocation4], %s158_s15 }
  0x52   : > { %s2297_s9 = scalar_lea.hbm %s2698_s30, 64  ;;  %p2299_p13 = pneg %p2706_p12 }
  0x53   : > { %p2298_p4 = scmp.ne.s32.totalorder %s2698_s30, %s2297_s9  ;;  %s2302_s25 = scalar_lea.hbm %s3690_s0, 256 }
  0x54   : > { %p2303_p6 = scmp.lt.u32.totalorder %s2698_s30, %s3690_s0  ;;  %p2304_p0 = scmp.lt.u32.totalorder %s2302_s25, %s2297_s9 }
  0x55   : > { %p2300_p3 = pnand %p2299_p13, %p2298_p4  ;;  %p2306_p10 = scmp.lt.u32.totalorder %s2297_s9, %s2698_s30 }
  0x56   : > { %p2305_p8 = por %p2304_p0, %p2303_p6 }
  0x57   : > { %p2301_p5 = pneg %p2300_p3 }
  0x58   : > { %p2307_p2 = por %p2306_p10, %p2305_p8 }
  0x5a   : > { %p2308_p7 = pnand %p2307_p2, %p2301_p5 }
  0x5c   : > { %2311 = shalt.err (!%p2308_p7)
}
  0x5d   : > { %s2312_s15 = scalar_lea.vmem %s2700_s27, 64  ;;  %s2486_s12 = smov [#allocation3]  }
  0x5e   : > { %p2313_p4 = scmp.ne.s32.totalorder %s2700_s27, %s2312_s15  ;;  %s2317_s18 = sshll.u32 %s2486_s12, 4  ;;  %s2318_s18 = int_to_ptr.vmem [resolvable:$false] %s2317_s18 }
  0x5f   : > { %s2319_s13 = scalar_lea.vmem %s2318_s18, 128  ;;  %p2320_p9 = scmp.lt.s32.totalorder %s2700_s27, %s2318_s18 }
  0x60   : > { %p2315_p3 = pnand %p2313_p4, %p2299_p13  ;;  %p2321_p6 = scmp.lt.s32.totalorder %s2319_s13, %s2312_s15 }
  0x62   : > { %p2316_p1 = pneg %p2315_p3  ;;  %p2322_p0 = por %p2321_p6, %p2320_p9 }
  0x64   : > { %p2323_p8 = pnand %p2322_p0, %p2316_p1 }
  0x66   : > { %2326 = shalt.err (!%p2323_p8)
}
  0x67   : > { %2163 = dma.hbm_to_vmem [thread:$0]  (!%p2706_p12), %s2698_s30, 64, %s2700_s27, %s159_s10  }
  0x68   : > { %s2327_s19 = scalar_lea.hbm %s2717_s23, 64  ;;  %p3756_p2 = pneg %p2612_p11 }
  0x69   : > { %p2328_p7 = scmp.ne.s32.totalorder %s2717_s23, %s2327_s19  ;;  %s2332_s1 = scalar_lea.hbm %s3692_s2, 128 }
  0x6a   : > { %p2333_p1 = scmp.lt.u32.totalorder %s2717_s23, %s3692_s2  ;;  %p2334_p5 = scmp.lt.u32.totalorder %s2332_s1, %s2327_s19 }
  0x6b   : > { %p2330_p13 = pnand %p2328_p7, %p3756_p2  ;;  %p2336_p4 = scmp.lt.u32.totalorder %s2327_s19, %s2717_s23 }
  0x6c   : > { %p2335_p10 = por %p2334_p5, %p2333_p1 }
  0x6d   : > { %p2331_p9 = pneg %p2330_p13 }
  0x6e   : > { %p2337_p3 = por %p2336_p4, %p2335_p10 }
  0x70   : > { %p2338_p12 = pnand %p2337_p3, %p2331_p9 }
  0x72   : > { %2341 = shalt.err (!%p2338_p12)
}
  0x73   : > { %s2342_s27 = scalar_lea.vmem %s210_s5, 64  ;;  %p3757_p0 = pmov %p3756_p2 }
  0x74   : > { %p2343_p6 = scmp.ne.s32.totalorder %s210_s5, %s2342_s27  ;;  %s2487_s30 = smov [#allocation8]  }
  0x75   : > { %s2347_s10 = sshll.u32 %s2487_s30, 4  ;;  %s2348_s10 = int_to_ptr.vmem [resolvable:$false] %s2347_s10 }
  0x76   : > { %p2345_p8 = pnand %p2343_p6, %p3757_p0  ;;  %s2349_s26 = scalar_lea.vmem %s2348_s10, 128 }
  0x77   : > { %p2350_p2 = scmp.lt.s32.totalorder %s210_s5, %s2348_s10  ;;  %p2351_p13 = scmp.lt.s32.totalorder %s2349_s26, %s2342_s27 }
  0x78   : > { %p2346_p7 = pneg %p2345_p8 }
  0x79   : > { %p2352_p1 = por %p2351_p13, %p2350_p2 }
  0x7b   : > { %p2353_p5 = pnand %p2352_p1, %p2346_p7 }
  0x7d   : > { %2356 = shalt.err (!%p2353_p5)
}
  0x7e   : > { %2169 = dma.hbm_to_vmem [thread:$0]  (!%p2612_p11), %s2717_s23, 64, %s210_s5, %s2621_s6  }
  0x7f   : > { %p3758_p9 = scmp.ne.s32.totalorder %s3746_s7, 0 }
  0x81   : > { %218 = sbr.rel (%p3758_p9) target bundleno = 654 (0x28e), region = 32 }
  0x88   : > { %s3759_s29 = sld [smem:[#allocation22_spill]]  ;;  %s220_s15 = sand.u32 1, %s2459_s16  }
  0x89   : > { %s2768_s12 = sshll.u32 %s220_s15, 2  ;;  %s221_s18 = scalar_lea.sflag [#allocation4], %s220_s15 }
  0x8a   : > { %s224_s13 = scalar_lea.vmem [#allocation3], %s2768_s12 }
  0x8e   : > { %p3760_p10 = scmp.ne.s32.totalorder %s3759_s29, 0 }
  0x90   : > { %2430 = dma.done.wait (%p3760_p10), %s221_s18, 64  }
  0x91   : > { %2432 = vsyncadd (%p3760_p10), %s221_s18, 4294967232  ;;  %s3761_s24 = sld [smem:[#allocation17_spill]]  ;;  %s3762_s19 = sld [smem:[#allocation14_spill]] }
  0x92   : > { %s3763_s9 = sld [smem:[#allocation18_spill]] }
  0x97   : > { %s229_s6 = sand.u32 1, %s3761_s24   ;;  %s2777_s5 = sand.u32 1, %s3762_s19  }
  0x98   : > { %s1926_s7 = sshll.u32 %s2777_s5, 3  ;;  %s230_s23 = scalar_lea.sflag [#allocation7], %s229_s6 }
  0x99   : > { %s2780_s11 = scalar_lea.vmem [#allocation6], %s1926_s7  ;;  %p3764_p11 = scmp.ne.s32.totalorder %s3763_s9, 0 }
  0x9b   : > { %2434 = dma.done.wait (%p3764_p11), %s230_s23, 192  }
  0x9c   : > { %2436 = vsyncadd (%p3764_p11), %s230_s23, 4294967104  ;;  %s1927_s1 = sshll.u32 %s2777_s5, 2  ;;  %s2787_s25 = scalar_lea.vmem [#allocation9], %s1926_s7 }
  0x9d   : > { %s242_s4 = scalar_lea.vmem [#allocation8], %s1927_s1  ;;  %s3765_s27 = sld [smem:[#allocation15_spill]] }
  0xa3   : > { %p1929_p4 = scmp.ne.s32.totalorder %s3765_s27, 0 }
  0xa4   : > { %v2488_v0 = vmov (!%p1929_p4), 0.0  }
  0xa5   : > { %278 = sbr.rel (%p1929_p4) target bundleno = 172 (0xac), region = 48  ;;  %279 = vst [vmem:[#allocation2] sm:$0xff] (!%p1929_p4), %v2488_v0 }
  0xac PF: > { %v281_v1 = vlaneseq  ;;  %s3766_s30 = sld [smem:[#allocation15_spill]]  ;;  %v280_v5 = vld [vmem:[%s242_s4] sm:$0xf] }
  0xae   : > { %v282_v2 = vand.u32 127, %v281_v1  ;;  %v2791_v3 = vshrl.u32 %v281_v1, 7 }
  0xb0   : > { %v283_v6 = vadd.s32 128, %v282_v2  ;;  %v2796_v7 = vsub.s32 0, %v2791_v3  ;;  %v299_v8 = vsub.s32 2, %v2791_v3  ;;  %v311_v9 = vsub.s32 3, %v2791_v3 }
  0xb1   : > { %v394_v10 = vadd.s32 8, %v2791_v3  ;;  %v284_v12 = vand.u32 15, %v282_v2  ;;  %v288_v13 = vshra.s32 %v282_v2, 4  ;;  %v307_v24 = vsub.s32 1, %v2791_v3 }
  0xb2   : > { %s1930_s10 = sshll.u32 %s3766_s30, 7  ;;  %3767 = vst [vmem:[#allocation23_spill] sm:$0xff] %v2796_v7  ;;  %v285_v14 = vand.u32 15, %v283_v6  ;;  %v289_v15 = vshra.s32 %v283_v6, 4  ;;  %v300_v16 = vrot.slane %v280_v5, %v299_v8  ;;  %v312_v17 = vrot.slane %v280_v5, %v311_v9  ;;  %p1931_p3 = scmp.ne.s32.totalorder %s3766_s30, 1 }
  0xb3   : > { %v2793_v4 = vstv %s1930_s10  ;;  %v286_v19 = vcvt.s32.f32 %v284_v12  ;;  %v290_v20 = vcvt.s32.f32 %v288_v13  ;;  %v296_v21 = vrot.slane %v280_v5, %v2796_v7 }
  0xb4   : > { %v2803_v11 = vadd.s32 %v2793_v4, %v2791_v3  ;;  %v2806_v18 = vadd.s32 %v2793_v4, %v394_v10  ;;  %v287_v22 = vcvt.s32.f32 %v285_v14  ;;  %v291_v23 = vcvt.s32.f32 %v289_v15 }
  0xb5   : > { %v395_v25 = vadd.s32 16, %v2791_v3  ;;  %v303_v26 = vadd.f32 %v296_v21, %v286_v19  ;;  %v396_v27 = vadd.s32 24, %v2791_v3  ;;  %v397_v28 = vadd.s32 32, %v2791_v3 }
  0xb6   : > { %v398_v29 = vadd.s32 40, %v2791_v3  ;;  %v304_v30 = vadd.f32 %v300_v16, %v287_v22  ;;  %v316_v31 = vadd.f32 %v312_v17, %v291_v23  ;;  %v308_v32 = vrot.slane %v280_v5, %v307_v24 }
  0xb7   : > { %v2815_v33 = vadd.s32 %v2793_v4, %v395_v25  ;;  %v317_v34 = vfloor.f32 %v303_v26  ;;  %v2818_v35 = vadd.s32 %v2793_v4, %v396_v27  ;;  %v2821_v36 = vadd.s32 %v2793_v4, %v397_v28 }
  0xb8   : > { %v2824_v37 = vadd.s32 %v2793_v4, %v398_v29  ;;  %v318_v38 = vfloor.f32 %v304_v30  ;;  %v320_v39 = vfloor.f32 %v316_v31  ;;  %v315_v40 = vadd.f32 %v308_v32, %v290_v20 }
  0xb9   : > { %v399_v41 = vadd.s32 48, %v2791_v3  ;;  %v2144_v42 = vtrunc.f32 %v317_v34  ;;  %v2827_v43 = vsub.f32 %v303_v26, %v317_v34  ;;  %v2830_v44 = vadd.s32 56, %v2791_v3 }
  0xba   : > { %v2833_v45 = vadd.s32 64, %v2791_v3  ;;  %v2146_v46 = vtrunc.f32 %v318_v38  ;;  %v2150_v47 = vtrunc.f32 %v320_v39  ;;  %v326_v48 = vsub.f32 %v304_v30, %v318_v38 }
  0xbb   : > { %v330_v49 = vsub.f32 %v316_v31, %v320_v39  ;;  %v319_v50 = vfloor.f32 %v315_v40  ;;  %v2835_v51 = vcvt.f32.s32 %v2144_v42  ;;  %v327_v52 = vsub.f32 1.0, %v2827_v43 }
  0xbc   : > { %v2839_v53 = vadd.s32 %v2793_v4, %v399_v41  ;;  %v2147_v54 = vcvt.f32.s32 %v2146_v46  ;;  %v2151_v55 = vcvt.f32.s32 %v2150_v47  ;;  %v328_v56 = vsub.f32 1.0, %v326_v48 }
  0xbd   : > { %v332_v57 = vsub.f32 1.0, %v330_v49  ;;  %v378_v58 = vmul.f32 %v330_v49, %v326_v48  ;;  %v2148_v59 = vtrunc.f32 %v319_v50  ;;  %v2841_v60 = vsub.f32 %v315_v40, %v319_v50 }
  0xbe   : > { %vm333_vm0 = vcmp.ge.s32.totalorder %v2835_v51, 0  ;;  %vm334_vm1 = vcmp.ge.s32.totalorder %v2147_v54, 0  ;;  %vm336_vm2 = vcmp.lt.s32.totalorder %v2147_v54, 16  ;;  %vm340_vm3 = vcmp.ge.s32.totalorder %v2147_v54, 4294967295 }
  0xbf   : > { %vm342_vm4 = vcmp.lt.s32.totalorder %v2147_v54, 15  ;;  %vm2844_vm5 = vmand %vm334_vm1, %vm336_vm2  ;;  %vm346_vm6 = vcmp.ge.s32.totalorder %v2151_v55, 0  ;;  %vm348_vm7 = vcmp.lt.s32.totalorder %v2151_v55, 16  ;;  %vm352_vm8 = vcmp.ge.s32.totalorder %v2151_v55, 4294967295 }
  0xc0   : > { %vm354_vm9 = vcmp.lt.s32.totalorder %v2151_v55, 15  ;;  %vm2848_vm10 = vmand %vm340_vm3, %vm342_vm4  ;;  %v360_v63 = vmul.f32 %v332_v57, %v328_v56  ;;  %v366_v0 = vmul.f32 %v332_v57, %v326_v48  ;;  %v372_v1 = vmul.f32 %v330_v49, %v328_v56 }
  0xc1   : > { %v382_v2 = vmul.u32 16, %v2151_v55  ;;  %vm2852_vm11 = vmand %vm346_vm6, %vm348_vm7  ;;  %v2856_v6 = vcvt.f32.s32 %v2148_v59  ;;  %v331_v8 = vsub.f32 1.0, %v2841_v60  ;;  %vm335_vm12 = vcmp.lt.s32.totalorder %v2835_v51, 16 }
  0xc2   : > { %vm339_vm13 = vcmp.ge.s32.totalorder %v2835_v51, 4294967295  ;;  %vm2861_vm14 = vmand %vm352_vm8, %vm354_vm9  ;;  %vm341_vm15 = vcmp.lt.s32.totalorder %v2835_v51, 15  ;;  %v371_v12 = vmul.f32 %v2841_v60, %v327_v52  ;;  %v2869_v13 = vmul.f32 %v2841_v60, %v2827_v43 }
  0xc3   : > { %v384_v10 = vadd.s32 %v2147_v54, %v382_v2  ;;  %vm358_vm1 = vmand %vm2844_vm5, %vm2852_vm11  ;;  %vm345_vm2 = vcmp.ge.s32.totalorder %v2856_v6, 0  ;;  %vm347_vm3 = vcmp.lt.s32.totalorder %v2856_v6, 16  ;;  %vm351_vm4 = vcmp.ge.s32.totalorder %v2856_v6, 4294967295 }
  0xc4   : > { %vm353_vm6 = vcmp.lt.s32.totalorder %v2856_v6, 15  ;;  %v362_v14 = vsel %vm358_vm1, %v360_v63, 0.0  ;;  %vm364_vm7 = vmand %vm2848_vm10, %vm2852_vm11  ;;  %v359_v22 = vmul.f32 %v331_v8, %v327_v52  ;;  %v365_v61 = vmul.f32 %v331_v8, %v2827_v43 }
  0xc5   : > { %v2884_v15 = vrot.slane %v384_v10, %v2796_v7  ;;  %v539_v16 = vadd.s32 1, %v384_v10  ;;  %v653_v17 = vadd.s32 16, %v384_v10  ;;  %v368_v19 = vsel %vm364_vm7, %v366_v0, 0.0  ;;  %vm370_vm8 = vmand %vm2844_vm5, %vm2861_vm14 }
  0xc6   : > { %v2891_v20 = vrot.slane %v362_v14, %v2796_v7  ;;  %v767_v21 = vadd.s32 17, %v384_v10  ;;  %v374_v23 = vsel %vm370_vm8, %v372_v1, 0.0  ;;  %vm376_vm9 = vmand %vm2848_vm10, %vm2861_vm14  ;;  %v386_v24 = vadd.f32 %v368_v19, %v362_v14 }
  0xc7   : > { %vm435_vm11 = vcmp.eq.s32.totalorder %v2803_v11, %v2884_v15  ;;  %vm437_vm5 = vcmp.eq.s32.totalorder %v2806_v18, %v2884_v15  ;;  %v380_v25 = vsel %vm376_vm9, %v378_v58, 0.0  ;;  %v2906_v28 = vrot.slane %v539_v16, %v2796_v7  ;;  %vm2912_vm10 = vmand %vm333_vm0, %vm335_vm12 }
  0xc8   : > { %v475_v26 = vsel %vm435_vm11, %v2891_v20, 0.0  ;;  %v477_v27 = vsel %vm437_vm5, %v2891_v20, 0.0  ;;  %v388_v30 = vadd.f32 %v386_v24, %v374_v23  ;;  %v2917_v31 = vrot.slane %v368_v19, %v2796_v7  ;;  %vm2929_vm14 = vmand %vm339_vm13, %vm341_vm15 }
  0xc9   : > { %v2920_v32 = vrot.slane %v653_v17, %v2796_v7  ;;  %v2923_v34 = vrot.slane %v374_v23, %v2796_v7  ;;  %vm549_vm0 = vcmp.eq.s32.totalorder %v2803_v11, %v2906_v28  ;;  %vm551_vm12 = vcmp.eq.s32.totalorder %v2806_v18, %v2906_v28  ;;  %vm2947_vm13 = vmand %vm345_vm2, %vm347_vm3 }
  0xca   : > { %v2938_v39 = vrot.slane %v767_v21, %v2796_v7  ;;  %v2941_v40 = vrot.slane %v380_v25, %v2796_v7  ;;  %v2951_v42 = vadd.f32 %v388_v30, %v380_v25  ;;  %v589_v46 = vsel %vm549_vm0, %v2917_v31, 0.0  ;;  %vm2961_vm1 = vmand %vm351_vm4, %vm353_vm6 }
  0xcb   : > { %v591_v47 = vsel %vm551_vm12, %v2917_v31, 0.0  ;;  %vm663_vm15 = vcmp.eq.s32.totalorder %v2803_v11, %v2920_v32  ;;  %v621_v49 = vadd.f32 %v589_v46, %v475_v26  ;;  %vm665_vm2 = vcmp.eq.s32.totalorder %v2806_v18, %v2920_v32  ;;  %vm357_vm3 = vmand %vm2912_vm10, %vm2947_vm13 }
  0xcc   : > { %3782 = vst [vmem:[#allocation24_spill] sm:$0xff] %v2951_v42  ;;  %v623_v50 = vadd.f32 %v591_v47, %v477_v27  ;;  %v703_v52 = vsel %vm663_vm15, %v2923_v34, 0.0  ;;  %v705_v54 = vsel %vm665_vm2, %v2923_v34, 0.0  ;;  %vm777_vm4 = vcmp.eq.s32.totalorder %v2803_v11, %v2938_v39  ;;  %vm363_vm7 = vmand %vm2929_vm14, %vm2947_vm13 }
  0xcd   : > { %vm779_vm6 = vcmp.eq.s32.totalorder %v2806_v18, %v2938_v39  ;;  %v361_v55 = vsel %vm357_vm3, %v359_v22, 0.0  ;;  %v735_v56 = vadd.f32 %v703_v52, %v621_v49  ;;  %v817_v58 = vsel %vm777_vm4, %v2941_v40, 0.0  ;;  %vm369_vm8 = vmand %vm2912_vm10, %vm2961_vm1 }
  0xce   : > { %v737_v57 = vadd.f32 %v705_v54, %v623_v50  ;;  %v819_v59 = vsel %vm779_vm6, %v2941_v40, 0.0  ;;  %v373_v62 = vsel %vm369_vm8, %v371_v12, 0.0  ;;  %vm375_vm9 = vmand %vm2929_vm14, %vm2961_vm1  ;;  %v381_v63 = vmul.u32 16, %v2856_v6 }
  0xcf   : > { %v2996_v0 = vrot.slane %v361_v55, %v2796_v7  ;;  %v849_v1 = vadd.f32 %v817_v58, %v735_v56  ;;  %v379_v5 = vsel %vm375_vm9, %v2869_v13, 0.0  ;;  %v3000_v9 = vrot.slane %v373_v62, %v2796_v7 }
  0xd0   : > { %v851_v2 = vadd.f32 %v819_v59, %v737_v57  ;;  %v367_v60 = vsel %vm363_vm7, %v365_v61, 0.0  ;;  %v383_v43 = vadd.s32 %v2835_v51, %v381_v63  ;;  %v3004_v8 = vrot.slane %v379_v5, %v2796_v7 }
  0xd1   : > { %vm439_vm11 = vcmp.eq.s32.totalorder %v2815_v33, %v2884_v15  ;;  %v882_v6 = vand.u32 4294901760, %v849_v1  ;;  %v385_v12 = vadd.f32 %v367_v60, %v361_v55  ;;  %v3009_v14 = vrot.slane %v367_v60, %v2796_v7 }
  0xd2   : > { %v886_v10 = vand.u32 4294901760, %v851_v2  ;;  %v3012_v13 = vrot.slane %v383_v43, %v2796_v7  ;;  %v538_v16 = vadd.s32 1, %v383_v43  ;;  %v652_v17 = vadd.s32 16, %v383_v43 }
  0xd3   : > { %v766_v19 = vadd.s32 17, %v383_v43  ;;  %v3016_v51 = vsub.f32 %v849_v1, %v882_v6  ;;  %v387_v23 = vadd.f32 %v385_v12, %v373_v62  ;;  %vm441_vm2 = vcmp.eq.s32.totalorder %v2818_v35, %v2884_v15 }
  0xd4   : > { %v3014_v21 = vpack.c.bf16 %v886_v10, %v882_v6  ;;  %v3018_v22 = vsub.f32 %v851_v2, %v886_v10  ;;  %vm434_vm5 = vcmp.eq.s32.totalorder %v2803_v11, %v3012_v13  ;;  %vm436_vm10 = vcmp.eq.s32.totalorder %v2806_v18, %v3012_v13 }
  0xd5   : > { %v3025_v24 = vrot.slane %v538_v16, %v2796_v7  ;;  %v3028_v25 = vrot.slane %v652_v17, %v2796_v7  ;;  %v3032_v26 = vadd.f32 %v387_v23, %v379_v5  ;;  %v474_v27 = vsel %vm434_vm5, %v2996_v0, 0.0 }
  0xd6   : > { %1943 = vmatprep.subr.bf16.mxu1 %v3014_v21  ;;  %2039 = vmatprep.subr.bf16.mxu0 %v3014_v21  ;;  %v476_v29 = vsel %vm436_vm10, %v2996_v0, 0.0  ;;  %v3037_v30 = vrot.slane %v766_v19, %v2796_v7  ;;  %v479_v54 = vsel %vm439_vm11, %v2891_v20, 0.0  ;;  %v481_v57 = vsel %vm441_vm2, %v2891_v20, 0.0 }
  0xd7   : > { %3785 = vst [vmem:[#allocation25_spill] sm:$0xff] %v3032_v26  ;;  %vm548_vm14 = vcmp.eq.s32.totalorder %v2803_v11, %v3025_v24  ;;  %vm550_vm0 = vcmp.eq.s32.totalorder %v2806_v18, %v3025_v24  ;;  %vm662_vm12 = vcmp.eq.s32.totalorder %v2803_v11, %v3028_v25  ;;  %vm664_vm13 = vcmp.eq.s32.totalorder %v2806_v18, %v3028_v25 }
  0xd8   : > { %v588_v38 = vsel %vm548_vm14, %v3009_v14, 0.0  ;;  %v590_v41 = vsel %vm550_vm0, %v3009_v14, 0.0  ;;  %v702_v46 = vsel %vm662_vm12, %v3000_v9, 0.0  ;;  %v704_v47 = vsel %vm664_vm13, %v3000_v9, 0.0 }
  0xd9   : > { %v620_v48 = vadd.f32 %v588_v38, %v474_v27  ;;  %v622_v49 = vadd.f32 %v590_v41, %v476_v29  ;;  %vm776_vm15 = vcmp.eq.s32.totalorder %v2803_v11, %v3037_v30  ;;  %vm778_vm1 = vcmp.eq.s32.totalorder %v2806_v18, %v3037_v30 }
  0xda   : > { %v816_v50 = vsel %vm776_vm15, %v3004_v8, 0.0  ;;  %v818_v52 = vsel %vm778_vm1, %v3004_v8, 0.0  ;;  %vm553_vm3 = vcmp.eq.s32.totalorder %v2815_v33, %v2906_v28  ;;  %vm555_vm4 = vcmp.eq.s32.totalorder %v2818_v35, %v2906_v28 }
  0xdb   : > { %v734_v55 = vadd.f32 %v702_v46, %v620_v48  ;;  %v736_v56 = vadd.f32 %v704_v47, %v622_v49  ;;  %v593_v11 = vsel %vm553_vm3, %v2917_v31, 0.0  ;;  %vm667_vm6 = vcmp.eq.s32.totalorder %v2815_v33, %v2920_v32 }
  0xdc   : > { %vm669_vm7 = vcmp.eq.s32.totalorder %v2818_v35, %v2920_v32  ;;  %v595_v59 = vsel %vm555_vm4, %v2917_v31, 0.0  ;;  %v625_v61 = vadd.f32 %v593_v11, %v479_v54  ;;  %v707_v63 = vsel %vm667_vm6, %v2923_v34, 0.0 }
  0xdd   : > { %v848_v18 = vadd.f32 %v816_v50, %v734_v55  ;;  %v850_v58 = vadd.f32 %v818_v52, %v736_v56  ;;  %v627_v62 = vadd.f32 %v595_v59, %v481_v57  ;;  %v709_v1 = vsel %vm669_vm7, %v2923_v34, 0.0 }
  0xde   : > { %vm781_vm8 = vcmp.eq.s32.totalorder %v2815_v33, %v2938_v39  ;;  %v739_v60 = vadd.f32 %v707_v63, %v625_v61  ;;  %vm783_vm9 = vcmp.eq.s32.totalorder %v2818_v35, %v2938_v39  ;;  %vm438_vm11 = vcmp.eq.s32.totalorder %v2815_v33, %v3012_v13 }
  0xdf   : > { %v884_v2 = vand.u32 4294901760, %v848_v18  ;;  %v888_v5 = vand.u32 4294901760, %v850_v58  ;;  %v741_v43 = vadd.f32 %v709_v1, %v627_v62  ;;  %v821_v6 = vsel %vm781_vm8, %v2941_v40, 0.0 }
  0xe0   : > { %v823_v10 = vsel %vm783_vm9, %v2941_v40, 0.0  ;;  %v853_v19 = vadd.f32 %v821_v6, %v739_v60  ;;  %vm440_vm5 = vcmp.eq.s32.totalorder %v2818_v35, %v3012_v13  ;;  %v478_v27 = vsel %vm438_vm11, %v2996_v0, 0.0 }
  0xe1   : > { %v3084_v12 = vpack.c.bf16 %v888_v5, %v884_v2  ;;  %v3086_v16 = vsub.f32 %v848_v18, %v884_v2  ;;  %v3088_v17 = vsub.f32 %v850_v58, %v888_v5  ;;  %v855_v23 = vadd.f32 %v823_v10, %v741_v43 }
  0xe2   : > { %vm552_vm10 = vcmp.eq.s32.totalorder %v2815_v33, %v3025_v24  ;;  %v890_v29 = vand.u32 4294901760, %v853_v19  ;;  %v480_v38 = vsel %vm440_vm5, %v2996_v0, 0.0  ;;  %vm554_vm14 = vcmp.eq.s32.totalorder %v2818_v35, %v3025_v24 }
  0xe3   : > { %1945 = vmatpush1.bf16.msra.mxu1 %v3084_v12  ;;  %2041 = vmatpush1.bf16.msra.mxu0 %v3084_v12  ;;  %v592_v41 = vsel %vm552_vm10, %v3009_v14, 0.0  ;;  %v894_v46 = vand.u32 4294901760, %v855_v23  ;;  %v594_v47 = vsel %vm554_vm14, %v3009_v14, 0.0  ;;  %vm666_vm0 = vcmp.eq.s32.totalorder %v2815_v33, %v3028_v25 }
  0xe4   : > { %v624_v48 = vadd.f32 %v592_v41, %v478_v27  ;;  %v3104_v49 = vsub.f32 %v853_v19, %v890_v29  ;;  %v626_v50 = vadd.f32 %v594_v47, %v480_v38  ;;  %vm668_vm12 = vcmp.eq.s32.totalorder %v2818_v35, %v3028_v25 }
  0xe5   : > { %v706_v52 = vsel %vm666_vm0, %v3000_v9, 0.0  ;;  %v3109_v54 = vpack.c.bf16 %v894_v46, %v890_v29  ;;  %v3111_v55 = vsub.f32 %v855_v23, %v894_v46  ;;  %v708_v56 = vsel %vm668_vm12, %v3000_v9, 0.0 }
  0xe6   : > { %v738_v57 = vadd.f32 %v706_v52, %v624_v48  ;;  %v740_v11 = vadd.f32 %v708_v56, %v626_v50  ;;  %vm780_vm13 = vcmp.eq.s32.totalorder %v2815_v33, %v3037_v30  ;;  %vm782_vm15 = vcmp.eq.s32.totalorder %v2818_v35, %v3037_v30 }
  0xe7   : > { %vm443_vm1 = vcmp.eq.s32.totalorder %v2821_v36, %v2884_v15  ;;  %1947 = vmatprep.subr.bf16.mxu1 %v3109_v54  ;;  %2043 = vmatprep.subr.bf16.mxu0 %v3109_v54  ;;  %v820_v18 = vsel %vm780_vm13, %v3004_v8, 0.0  ;;  %v822_v58 = vsel %vm782_vm15, %v3004_v8, 0.0  ;;  %vm445_vm2 = vcmp.eq.s32.totalorder %v2824_v37, %v2884_v15 }
  0xe8   : > { %v483_v59 = vsel %vm443_vm1, %v2891_v20, 0.0  ;;  %v852_v33 = vadd.f32 %v820_v18, %v738_v57  ;;  %v854_v61 = vadd.f32 %v822_v58, %v740_v11  ;;  %v485_v35 = vsel %vm445_vm2, %v2891_v20, 0.0 }
  0xe9   : > { %vm557_vm3 = vcmp.eq.s32.totalorder %v2821_v36, %v2906_v28  ;;  %vm559_vm4 = vcmp.eq.s32.totalorder %v2824_v37, %v2906_v28  ;;  %vm671_vm6 = vcmp.eq.s32.totalorder %v2821_v36, %v2920_v32  ;;  %vm673_vm7 = vcmp.eq.s32.totalorder %v2824_v37, %v2920_v32 }
  0xea   : > { %v597_v62 = vsel %vm557_vm3, %v2917_v31, 0.0  ;;  %v892_v63 = vand.u32 4294901760, %v852_v33  ;;  %v896_v1 = vand.u32 4294901760, %v854_v61  ;;  %v599_v2 = vsel %vm559_vm4, %v2917_v31, 0.0 }
  0xeb   : > { %v629_v5 = vadd.f32 %v597_v62, %v483_v59  ;;  %v631_v60 = vadd.f32 %v599_v2, %v485_v35  ;;  %v711_v43 = vsel %vm671_vm6, %v2923_v34, 0.0  ;;  %v713_v6 = vsel %vm673_vm7, %v2923_v34, 0.0 }
  0xec   : > { %vm785_vm8 = vcmp.eq.s32.totalorder %v2821_v36, %v2938_v39  ;;  %v3142_v10 = vpack.c.bf16 %v896_v1, %v892_v63  ;;  %v3144_v19 = vsub.f32 %v852_v33, %v892_v63  ;;  %v3146_v23 = vsub.f32 %v854_v61, %v896_v1 }
  0xed   : > { %v743_v27 = vadd.f32 %v711_v43, %v629_v5  ;;  %v745_v29 = vadd.f32 %v713_v6, %v631_v60  ;;  %vm787_vm9 = vcmp.eq.s32.totalorder %v2824_v37, %v2938_v39  ;;  %v825_v38 = vsel %vm785_vm8, %v2941_v40, 0.0 }
  0xee   : > { %vm442_vm11 = vcmp.eq.s32.totalorder %v2821_v36, %v3012_v13  ;;  %1949 = vmatpush1.bf16.msra.mxu1 %v3142_v10  ;;  %2045 = vmatpush1.bf16.msra.mxu0 %v3142_v10  ;;  %v827_v41 = vsel %vm787_vm9, %v2941_v40, 0.0  ;;  %vm444_vm5 = vcmp.eq.s32.totalorder %v2824_v37, %v3012_v13  ;;  %vm556_vm10 = vcmp.eq.s32.totalorder %v2821_v36, %v3025_v24 }
  0xef   : > { %v857_v46 = vadd.f32 %v825_v38, %v743_v27  ;;  %v482_v47 = vsel %vm442_vm11, %v2996_v0, 0.0  ;;  %v859_v48 = vadd.f32 %v827_v41, %v745_v29  ;;  %v484_v50 = vsel %vm444_vm5, %v2996_v0, 0.0 }
  0xf0   : > { %vm558_vm14 = vcmp.eq.s32.totalorder %v2824_v37, %v3025_v24  ;;  %v596_v56 = vsel %vm556_vm10, %v3009_v14, 0.0  ;;  %vm670_vm0 = vcmp.eq.s32.totalorder %v2821_v36, %v3028_v25  ;;  %vm672_vm12 = vcmp.eq.s32.totalorder %v2824_v37, %v3028_v25 }
  0xf1   : > { %v898_v52 = vand.u32 4294901760, %v857_v46  ;;  %v598_v57 = vsel %vm558_vm14, %v3009_v14, 0.0  ;;  %v902_v11 = vand.u32 4294901760, %v859_v48  ;;  %v628_v18 = vadd.f32 %v596_v56, %v482_v47 }
  0xf2   : > { %v630_v58 = vadd.f32 %v598_v57, %v484_v50  ;;  %v710_v33 = vsel %vm670_vm0, %v3000_v9, 0.0  ;;  %v712_v61 = vsel %vm672_vm12, %v3000_v9, 0.0  ;;  %vm784_vm13 = vcmp.eq.s32.totalorder %v2821_v36, %v3037_v30 }
  0xf3   : > { %v3170_v59 = vsub.f32 %v857_v46, %v898_v52  ;;  %v3176_v35 = vpack.c.bf16 %v902_v11, %v898_v52  ;;  %v3178_v62 = vsub.f32 %v859_v48, %v902_v11  ;;  %v742_v63 = vadd.f32 %v710_v33, %v628_v18 }
  0xf4   : > { %v744_v1 = vadd.f32 %v712_v61, %v630_v58  ;;  %vm786_vm15 = vcmp.eq.s32.totalorder %v2824_v37, %v3037_v30  ;;  %v824_v2 = vsel %vm784_vm13, %v3004_v8, 0.0  ;;  %v417_v5 = vadd.s32 %v2793_v4, %v2830_v44 }
  0xf5   : > { %3786 = vst [vmem:[#allocation26_spill] sm:$0xff] %v3176_v35  ;;  %vm447_vm1 = vcmp.eq.s32.totalorder %v2839_v53, %v2884_v15  ;;  %1951 = vmatprep.subr.bf16.mxu1 %v3176_v35  ;;  %2047 = vmatprep.subr.bf16.mxu0 %v3176_v35  ;;  %v826_v36 = vsel %vm786_vm15, %v3004_v8, 0.0  ;;  %v856_v60 = vadd.f32 %v824_v2, %v742_v63 }
  0xf6   : > { %v487_v43 = vsel %vm447_vm1, %v2891_v20, 0.0  ;;  %vm561_vm2 = vcmp.eq.s32.totalorder %v2839_v53, %v2906_v28  ;;  %v858_v37 = vadd.f32 %v826_v36, %v744_v1  ;;  %vm449_vm3 = vcmp.eq.s32.totalorder %v417_v5, %v2884_v15 }
  0xf7   : > { %vm563_vm4 = vcmp.eq.s32.totalorder %v417_v5, %v2906_v28  ;;  %v601_v44 = vsel %vm561_vm2, %v2917_v31, 0.0  ;;  %v900_v6 = vand.u32 4294901760, %v856_v60  ;;  %v489_v27 = vsel %vm449_vm3, %v2891_v20, 0.0 }
  0xf8   : > { %v603_v29 = vsel %vm563_vm4, %v2917_v31, 0.0  ;;  %v633_v38 = vadd.f32 %v601_v44, %v487_v43  ;;  %v904_v41 = vand.u32 4294901760, %v858_v37  ;;  %vm675_vm6 = vcmp.eq.s32.totalorder %v2839_v53, %v2920_v32 }
  0xf9   : > { %v635_v46 = vadd.f32 %v603_v29, %v489_v27  ;;  %vm677_vm7 = vcmp.eq.s32.totalorder %v417_v5, %v2920_v32  ;;  %v3201_v47 = vsub.f32 %v856_v60, %v900_v6  ;;  %v715_v48 = vsel %vm675_vm6, %v2923_v34, 0.0 }
  0xfa   : > { %v717_v50 = vsel %vm677_vm7, %v2923_v34, 0.0  ;;  %vm789_vm8 = vcmp.eq.s32.totalorder %v2839_v53, %v2938_v39  ;;  %v3207_v52 = vpack.c.bf16 %v904_v41, %v900_v6  ;;  %v3209_v56 = vsub.f32 %v858_v37, %v904_v41 }
  0xfb   : > { %v747_v57 = vadd.f32 %v715_v48, %v633_v38  ;;  %v749_v11 = vadd.f32 %v717_v50, %v635_v46  ;;  %vm791_vm9 = vcmp.eq.s32.totalorder %v417_v5, %v2938_v39  ;;  %v829_v18 = vsel %vm789_vm8, %v2941_v40, 0.0 }
  0xfc   : > { %3787 = vst [vmem:[#allocation27_spill] sm:$0xff] %v3207_v52  ;;  %vm446_vm11 = vcmp.eq.s32.totalorder %v2839_v53, %v3012_v13  ;;  %vm448_vm5 = vcmp.eq.s32.totalorder %v417_v5, %v3012_v13  ;;  %1953 = vmatpush1.bf16.msra.mxu1 %v3207_v52  ;;  %2049 = vmatpush1.bf16.msra.mxu0 %v3207_v52  ;;  %v831_v58 = vsel %vm791_vm9, %v2941_v40, 0.0 }
  0xfd   : > { %v861_v33 = vadd.f32 %v829_v18, %v747_v57  ;;  %v486_v61 = vsel %vm446_vm11, %v2996_v0, 0.0  ;;  %v488_v63 = vsel %vm448_vm5, %v2996_v0, 0.0  ;;  %v863_v1 = vadd.f32 %v831_v58, %v749_v11 }
  0xfe   : > { %vm560_vm10 = vcmp.eq.s32.totalorder %v2839_v53, %v3025_v24  ;;  %vm562_vm14 = vcmp.eq.s32.totalorder %v417_v5, %v3025_v24  ;;  %vm674_vm0 = vcmp.eq.s32.totalorder %v2839_v53, %v3028_v25  ;;  %vm676_vm12 = vcmp.eq.s32.totalorder %v417_v5, %v3028_v25 }
  0xff   : > { %v906_v2 = vand.u32 4294901760, %v861_v33  ;;  %v600_v36 = vsel %vm560_vm10, %v3009_v14, 0.0  ;;  %v602_v60 = vsel %vm562_vm14, %v3009_v14, 0.0  ;;  %v910_v43 = vand.u32 4294901760, %v863_v1 }
 0x100   : > { %v632_v37 = vadd.f32 %v600_v36, %v486_v61  ;;  %v634_v44 = vadd.f32 %v602_v60, %v488_v63  ;;  %v714_v6 = vsel %vm674_vm0, %v3000_v9, 0.0  ;;  %v716_v29 = vsel %vm676_vm12, %v3000_v9, 0.0 }
 0x101   : > { %v3230_v27 = vsub.f32 %v861_v33, %v906_v2  ;;  %vm788_vm13 = vcmp.eq.s32.totalorder %v2839_v53, %v3037_v30  ;;  %vm790_vm15 = vcmp.eq.s32.totalorder %v417_v5, %v3037_v30  ;;  %v3236_v38 = vpack.c.bf16 %v910_v43, %v906_v2 }
 0x102   : > { %v3238_v41 = vsub.f32 %v863_v1, %v910_v43  ;;  %v746_v46 = vadd.f32 %v714_v6, %v632_v37  ;;  %v748_v48 = vadd.f32 %v716_v29, %v634_v44  ;;  %v828_v50 = vsel %vm788_vm13, %v3004_v8, 0.0 }
 0x103   : > { %3788 = vst [vmem:[#allocation28_spill] sm:$0xff] %v3236_v38  ;;  %v830_v57 = vsel %vm790_vm15, %v3004_v8, 0.0  ;;  %v402_v11 = vadd.s32 72, %v2791_v3  ;;  %v418_v18 = vadd.s32 %v2793_v4, %v2833_v45  ;;  %1955 = vmatprep.subr.bf16.mxu1 %v3236_v38  ;;  %2051 = vmatprep.subr.bf16.mxu0 %v3236_v38  ;;  %v403_v58 = vadd.s32 80, %v2791_v3 }
 0x104   : > { %v860_v53 = vadd.f32 %v828_v50, %v746_v46  ;;  %v862_v5 = vadd.f32 %v830_v57, %v748_v48  ;;  %v404_v33 = vadd.s32 88, %v2791_v3 }
 0x105   : > { %v419_v61 = vadd.s32 %v2793_v4, %v402_v11  ;;  %vm451_vm1 = vcmp.eq.s32.totalorder %v418_v18, %v2884_v15  ;;  %vm565_vm2 = vcmp.eq.s32.totalorder %v418_v18, %v2906_v28  ;;  %vm679_vm3 = vcmp.eq.s32.totalorder %v418_v18, %v2920_v32 }
 0x106   : > { %v908_v63 = vand.u32 4294901760, %v860_v53  ;;  %v912_v45 = vand.u32 4294901760, %v862_v5  ;;  %v491_v1 = vsel %vm451_vm1, %v2891_v20, 0.0  ;;  %v605_v2 = vsel %vm565_vm2, %v2917_v31, 0.0 }
 0x107   : > { %vm453_vm4 = vcmp.eq.s32.totalorder %v419_v61, %v2884_v15  ;;  %vm567_vm6 = vcmp.eq.s32.totalorder %v419_v61, %v2906_v28  ;;  %v637_v36 = vadd.f32 %v605_v2, %v491_v1  ;;  %vm681_vm7 = vcmp.eq.s32.totalorder %v419_v61, %v2920_v32 }
 0x108   : > { %v3258_v60 = vpack.c.bf16 %v912_v45, %v908_v63  ;;  %v3260_v43 = vsub.f32 %v860_v53, %v908_v63  ;;  %v3262_v37 = vsub.f32 %v862_v5, %v912_v45  ;;  %v493_v44 = vsel %vm453_vm4, %v2891_v20, 0.0 }
 0x109   : > { %v607_v6 = vsel %vm567_vm6, %v2917_v31, 0.0  ;;  %v719_v29 = vsel %vm679_vm3, %v2923_v34, 0.0  ;;  %v721_v46 = vsel %vm681_vm7, %v2923_v34, 0.0  ;;  %vm793_vm8 = vcmp.eq.s32.totalorder %v418_v18, %v2938_v39 }
 0x10a   : > { %3789 = vst [vmem:[#allocation29_spill] sm:$0xff] %v3258_v60  ;;  %1957 = vmatpush1.bf16.msra.mxu1 %v3258_v60  ;;  %2053 = vmatpush1.bf16.msra.mxu0 %v3258_v60  ;;  %v639_v48 = vadd.f32 %v607_v6, %v493_v44  ;;  %v751_v50 = vadd.f32 %v719_v29, %v637_v36  ;;  %v833_v57 = vsel %vm793_vm8, %v2941_v40, 0.0 }
 0x10b   : > { %vm795_vm9 = vcmp.eq.s32.totalorder %v419_v61, %v2938_v39  ;;  %vm450_vm11 = vcmp.eq.s32.totalorder %v418_v18, %v3012_v13  ;;  %vm452_vm5 = vcmp.eq.s32.totalorder %v419_v61, %v3012_v13  ;;  %vm564_vm10 = vcmp.eq.s32.totalorder %v418_v18, %v3025_v24 }
 0x10c   : > { %v835_v11 = vsel %vm795_vm9, %v2941_v40, 0.0  ;;  %v753_v53 = vadd.f32 %v721_v46, %v639_v48  ;;  %v865_v5 = vadd.f32 %v833_v57, %v751_v50  ;;  %v490_v63 = vsel %vm450_vm11, %v2996_v0, 0.0 }
 0x10d   : > { %v492_v45 = vsel %vm452_vm5, %v2996_v0, 0.0  ;;  %vm566_vm14 = vcmp.eq.s32.totalorder %v419_v61, %v3025_v24  ;;  %v604_v1 = vsel %vm564_vm10, %v3009_v14, 0.0  ;;  %vm678_vm0 = vcmp.eq.s32.totalorder %v418_v18, %v3028_v25 }
 0x10e   : > { %vm680_vm12 = vcmp.eq.s32.totalorder %v419_v61, %v3028_v25  ;;  %v867_v2 = vadd.f32 %v835_v11, %v753_v53  ;;  %v914_v36 = vand.u32 4294901760, %v865_v5  ;;  %v606_v44 = vsel %vm566_vm14, %v3009_v14, 0.0 }
 0x10f   : > { %v636_v6 = vadd.f32 %v604_v1, %v490_v63  ;;  %v638_v29 = vadd.f32 %v606_v44, %v492_v45  ;;  %v718_v46 = vsel %vm678_vm0, %v3000_v9, 0.0  ;;  %v720_v48 = vsel %vm680_vm12, %v3000_v9, 0.0 }
 0x110   : > { %vm792_vm13 = vcmp.eq.s32.totalorder %v418_v18, %v3037_v30  ;;  %v918_v50 = vand.u32 4294901760, %v867_v2  ;;  %v3287_v57 = vsub.f32 %v865_v5, %v914_v36  ;;  %vm794_vm15 = vcmp.eq.s32.totalorder %v419_v61, %v3037_v30 }
 0x111   : > { %v750_v7 = vadd.f32 %v718_v46, %v636_v6  ;;  %v752_v42 = vadd.f32 %v720_v48, %v638_v29  ;;  %v832_v11 = vsel %vm792_vm13, %v3004_v8, 0.0  ;;  %v834_v53 = vsel %vm794_vm15, %v3004_v8, 0.0 }
 0x112   : > { %v420_v63 = vadd.s32 %v2793_v4, %v403_v58  ;;  %v3293_v45 = vpack.c.bf16 %v918_v50, %v914_v36  ;;  %v3295_v1 = vsub.f32 %v867_v2, %v918_v50  ;;  %v421_v18 = vadd.s32 %v2793_v4, %v404_v33 }
 0x113   : > { %v864_v44 = vadd.f32 %v832_v11, %v750_v7  ;;  %v866_v26 = vadd.f32 %v834_v53, %v752_v42 }
 0x114   : > { %3790 = vst [vmem:[#allocation30_spill] sm:$0xff] %v3293_v45  ;;  %vm455_vm1 = vcmp.eq.s32.totalorder %v420_v63, %v2884_v15  ;;  %vm569_vm2 = vcmp.eq.s32.totalorder %v420_v63, %v2906_v28  ;;  %vm683_vm3 = vcmp.eq.s32.totalorder %v420_v63, %v2920_v32  ;;  %1959 = vmatprep.subr.bf16.mxu1 %v3293_v45 }
 0x115   : > { %2055 = vmatprep.subr.bf16.mxu0 %v3293_v45  ;;  %v916_v61 = vand.u32 4294901760, %v864_v44  ;;  %vm457_vm4 = vcmp.eq.s32.totalorder %v421_v18, %v2884_v15  ;;  %v495_v58 = vsel %vm455_vm1, %v2891_v20, 0.0  ;;  %vm571_vm6 = vcmp.eq.s32.totalorder %v421_v18, %v2906_v28 }
 0x116   : > { %v920_v7 = vand.u32 4294901760, %v866_v26  ;;  %v497_v42 = vsel %vm457_vm4, %v2891_v20, 0.0  ;;  %v609_v33 = vsel %vm569_vm2, %v2917_v31, 0.0  ;;  %v611_v5 = vsel %vm571_vm6, %v2917_v31, 0.0 }
 0x117   : > { %v3309_v2 = vsub.f32 %v864_v44, %v916_v61  ;;  %v641_v36 = vadd.f32 %v609_v33, %v495_v58  ;;  %v643_v6 = vadd.f32 %v611_v5, %v497_v42  ;;  %vm685_vm7 = vcmp.eq.s32.totalorder %v421_v18, %v2920_v32 }
 0x118   : > { %v3312_v29 = vpack.c.bf16 %v920_v7, %v916_v61  ;;  %v3314_v46 = vsub.f32 %v866_v26, %v920_v7  ;;  %v723_v48 = vsel %vm683_vm3, %v2923_v34, 0.0  ;;  %v725_v50 = vsel %vm685_vm7, %v2923_v34, 0.0 }
 0x119   : > { %v755_v11 = vadd.f32 %v723_v48, %v641_v36  ;;  %v757_v53 = vadd.f32 %v725_v50, %v643_v6  ;;  %vm797_vm8 = vcmp.eq.s32.totalorder %v420_v63, %v2938_v39  ;;  %vm799_vm9 = vcmp.eq.s32.totalorder %v421_v18, %v2938_v39 }
 0x11a   : > { %3791 = vst [vmem:[#allocation31_spill] sm:$0xff] %v3312_v29  ;;  %1961 = vmatpush1.bf16.msra.mxu1 %v3312_v29  ;;  %2057 = vmatpush1.bf16.msra.mxu0 %v3312_v29  ;;  %v837_v44 = vsel %vm797_vm8, %v2941_v40, 0.0  ;;  %v839_v26 = vsel %vm799_vm9, %v2941_v40, 0.0  ;;  %vm454_vm11 = vcmp.eq.s32.totalorder %v420_v63, %v3012_v13  ;;  %vm456_vm5 = vcmp.eq.s32.totalorder %v421_v18, %v3012_v13 }
 0x11b   : > { %v869_v61 = vadd.f32 %v837_v44, %v755_v11  ;;  %v871_v58 = vadd.f32 %v839_v26, %v757_v53  ;;  %v494_v7 = vsel %vm454_vm11, %v2996_v0, 0.0  ;;  %v496_v42 = vsel %vm456_vm5, %v2996_v0, 0.0 }
 0x11c   : > { %vm568_vm10 = vcmp.eq.s32.totalorder %v420_v63, %v3025_v24  ;;  %vm570_vm14 = vcmp.eq.s32.totalorder %v421_v18, %v3025_v24  ;;  %vm682_vm0 = vcmp.eq.s32.totalorder %v420_v63, %v3028_v25  ;;  %vm684_vm12 = vcmp.eq.s32.totalorder %v421_v18, %v3028_v25 }
 0x11d   : > { %v922_v33 = vand.u32 4294901760, %v869_v61  ;;  %v926_v5 = vand.u32 4294901760, %v871_v58  ;;  %v608_v36 = vsel %vm568_vm10, %v3009_v14, 0.0  ;;  %v610_v6 = vsel %vm570_vm14, %v3009_v14, 0.0 }
 0x11e   : > { %v640_v48 = vadd.f32 %v608_v36, %v494_v7  ;;  %v642_v50 = vadd.f32 %v610_v6, %v496_v42  ;;  %v722_v11 = vsel %vm682_vm0, %v3000_v9, 0.0  ;;  %v724_v53 = vsel %vm684_vm12, %v3000_v9, 0.0 }
 0x11f   : > { %v3338_v44 = vpack.c.bf16 %v926_v5, %v922_v33  ;;  %v3340_v26 = vsub.f32 %v869_v61, %v922_v33  ;;  %v3342_v29 = vsub.f32 %v871_v58, %v926_v5  ;;  %vm796_vm13 = vcmp.eq.s32.totalorder %v420_v63, %v3037_v30 }
 0x120   : > { %v754_v45 = vadd.f32 %v722_v11, %v640_v48  ;;  %v756_v60 = vadd.f32 %v724_v53, %v642_v50  ;;  %vm798_vm15 = vcmp.eq.s32.totalorder %v421_v18, %v3037_v30  ;;  %v836_v38 = vsel %vm796_vm13, %v3004_v8, 0.0 }
 0x121   : > { %3792 = vst [vmem:[#allocation32_spill] sm:$0xff] %v3338_v44  ;;  %1963 = vmatprep.subr.bf16.mxu1 %v3338_v44  ;;  %2059 = vmatprep.subr.bf16.mxu0 %v3338_v44  ;;  %v838_v7 = vsel %vm798_vm15, %v3004_v8, 0.0  ;;  %v405_v42 = vadd.s32 96, %v2791_v3  ;;  %v406_v61 = vadd.s32 104, %v2791_v3  ;;  %v407_v58 = vadd.s32 112, %v2791_v3 }
 0x122   : > { %v868_v33 = vadd.f32 %v836_v38, %v754_v45  ;;  %v870_v63 = vadd.f32 %v838_v7, %v756_v60  ;;  %v408_v5 = vadd.s32 120, %v2791_v3  ;;  %v3720_v48 = vmov 0.0  }
 0x123   : > { %v422_v18 = vadd.s32 %v2793_v4, %v405_v42  ;;  %v423_v36 = vadd.s32 %v2793_v4, %v406_v61  ;;  %v3357_v6 = vadd.s32 %v2793_v4, %v407_v58  ;;  %978 = vmatprep.mubr.f32.mxu1 %v3720_v48  ;;  %1455 = vmatprep.mubr.f32.mxu0 %v3720_v48 }
 0x124   : > { %v924_v11 = vand.u32 4294901760, %v868_v33  ;;  %v928_v53 = vand.u32 4294901760, %v870_v63  ;;  %v3363_v38 = vadd.s32 %v2793_v4, %v408_v5 }
 0x125   : > { %vm459_vm1 = vcmp.eq.s32.totalorder %v422_v18, %v2884_v15  ;;  %vm461_vm2 = vcmp.eq.s32.totalorder %v423_v36, %v2884_v15  ;;  %vm573_vm3 = vcmp.eq.s32.totalorder %v422_v18, %v2906_v28  ;;  %vm575_vm4 = vcmp.eq.s32.totalorder %v423_v36, %v2906_v28 }
 0x126   : > { %v3370_v60 = vpack.c.bf16 %v928_v53, %v924_v11  ;;  %v3372_v45 = vsub.f32 %v868_v33, %v924_v11  ;;  %v3374_v7 = vsub.f32 %v870_v63, %v928_v53  ;;  %v499_v42 = vsel %vm459_vm1, %v2891_v20, 0.0 }
 0x127   : > { %v501_v4 = vsel %vm461_vm2, %v2891_v20, 0.0  ;;  %v613_v61 = vsel %vm573_vm3, %v2917_v31, 0.0  ;;  %v615_v58 = vsel %vm575_vm4, %v2917_v31, 0.0  ;;  %vm687_vm6 = vcmp.eq.s32.totalorder %v422_v18, %v2920_v32 }
 0x128   : > { %3793 = vst [vmem:[#allocation33_spill] sm:$0xff] %v3370_v60  ;;  %1965 = vmatpush1.bf16.msra.mxu1 %v3370_v60  ;;  %2061 = vmatpush1.bf16.msra.mxu0 %v3370_v60  ;;  %v645_v5 = vadd.f32 %v613_v61, %v499_v42  ;;  %v647_v48 = vadd.f32 %v615_v58, %v501_v4  ;;  %v727_v33 = vsel %vm687_vm6, %v2923_v34, 0.0 }
 0x129   : > { %vm689_vm7 = vcmp.eq.s32.totalorder %v423_v36, %v2920_v32  ;;  %vm801_vm8 = vcmp.eq.s32.totalorder %v422_v18, %v2938_v39  ;;  %vm803_vm9 = vcmp.eq.s32.totalorder %v423_v36, %v2938_v39  ;;  %vm458_vm11 = vcmp.eq.s32.totalorder %v422_v18, %v3012_v13 }
 0x12a   : > { %v729_v63 = vsel %vm689_vm7, %v2923_v34, 0.0  ;;  %v759_v11 = vadd.f32 %v727_v33, %v645_v5  ;;  %v841_v3 = vsel %vm801_vm8, %v2941_v40, 0.0  ;;  %v843_v50 = vsel %vm803_vm9, %v2941_v40, 0.0 }
 0x12b   : > { %v761_v53 = vadd.f32 %v729_v63, %v647_v48  ;;  %vm460_vm5 = vcmp.eq.s32.totalorder %v423_v36, %v3012_v13  ;;  %v498_v42 = vsel %vm458_vm11, %v2996_v0, 0.0  ;;  %vm572_vm10 = vcmp.eq.s32.totalorder %v422_v18, %v3025_v24 }
 0x12c   : > { %vm574_vm14 = vcmp.eq.s32.totalorder %v423_v36, %v3025_v24  ;;  %v873_v4 = vadd.f32 %v841_v3, %v759_v11  ;;  %v500_v58 = vsel %vm460_vm5, %v2996_v0, 0.0  ;;  %v612_v60 = vsel %vm572_vm10, %v3009_v14, 0.0 }
 0x12d   : > { %v875_v61 = vadd.f32 %v843_v50, %v761_v53  ;;  %v614_v48 = vsel %vm574_vm14, %v3009_v14, 0.0  ;;  %v644_v5 = vadd.f32 %v612_v60, %v498_v42  ;;  %vm686_vm0 = vcmp.eq.s32.totalorder %v422_v18, %v3028_v25 }
 0x12e   : > { %vm688_vm12 = vcmp.eq.s32.totalorder %v423_v36, %v3028_v25  ;;  %v930_v33 = vand.u32 4294901760, %v873_v4  ;;  %v646_v44 = vadd.f32 %v614_v48, %v500_v58  ;;  %v726_v52 = vsel %vm686_vm0, %v3000_v9, 0.0 }
 0x12f   : > { %v934_v63 = vand.u32 4294901760, %v875_v61  ;;  %v728_v35 = vsel %vm688_vm12, %v3000_v9, 0.0  ;;  %v758_v3 = vadd.f32 %v726_v52, %v644_v5  ;;  %vm800_vm13 = vcmp.eq.s32.totalorder %v422_v18, %v3037_v30 }
 0x130   : > { %vm802_vm15 = vcmp.eq.s32.totalorder %v423_v36, %v3037_v30  ;;  %v3406_v11 = vsub.f32 %v873_v4, %v930_v33  ;;  %v760_v53 = vadd.f32 %v728_v35, %v646_v44  ;;  %v840_v42 = vsel %vm800_vm13, %v3004_v8, 0.0 }
 0x131   : > { %v3404_v50 = vpack.c.bf16 %v934_v63, %v930_v33  ;;  %v3408_v60 = vsub.f32 %v875_v61, %v934_v63  ;;  %v842_v58 = vsel %vm802_vm15, %v3004_v8, 0.0  ;;  %vm463_vm1 = vcmp.eq.s32.totalorder %v3357_v6, %v2884_v15 }
 0x132   : > { %vm465_vm2 = vcmp.eq.s32.totalorder %v3363_v38, %v2884_v15  ;;  %v872_v52 = vadd.f32 %v840_v42, %v758_v3  ;;  %v874_v18 = vadd.f32 %v842_v58, %v760_v53  ;;  %v503_v36 = vsel %vm463_vm1, %v2891_v20, 0.0 }
 0x133   : > { %1967 = vmatprep.subr.bf16.mxu1 %v3404_v50  ;;  %2063 = vmatprep.subr.bf16.mxu0 %v3404_v50  ;;  %v505_v35 = vsel %vm465_vm2, %v2891_v20, 0.0  ;;  %vm577_vm3 = vcmp.eq.s32.totalorder %v3357_v6, %v2906_v28  ;;  %vm579_vm4 = vcmp.eq.s32.totalorder %v3363_v38, %v2906_v28  ;;  %vm691_vm6 = vcmp.eq.s32.totalorder %v3357_v6, %v2920_v32 }
 0x134   : > { %vm693_vm7 = vcmp.eq.s32.totalorder %v3363_v38, %v2920_v32  ;;  %v932_v15 = vand.u32 4294901760, %v872_v52  ;;  %v936_v44 = vand.u32 4294901760, %v874_v18  ;;  %v617_v4 = vsel %vm577_vm3, %v2917_v31, 0.0 }
 0x135   : > { %v619_v61 = vsel %vm579_vm4, %v2917_v31, 0.0  ;;  %v649_v48 = vadd.f32 %v617_v4, %v503_v36  ;;  %v731_v5 = vsel %vm691_vm6, %v2923_v34, 0.0  ;;  %v733_v33 = vsel %vm693_vm7, %v2923_v34, 0.0 }
 0x136   : > { %v651_v20 = vadd.f32 %v619_v61, %v505_v35  ;;  %v3432_v63 = vpack.c.bf16 %v936_v44, %v932_v15  ;;  %v3434_v28 = vsub.f32 %v872_v52, %v932_v15  ;;  %v3436_v3 = vsub.f32 %v874_v18, %v936_v44 }
 0x137   : > { %vm805_vm8 = vcmp.eq.s32.totalorder %v3357_v6, %v2938_v39  ;;  %v763_v32 = vadd.f32 %v731_v5, %v649_v48  ;;  %vm807_vm9 = vcmp.eq.s32.totalorder %v3363_v38, %v2938_v39  ;;  %vm462_vm11 = vcmp.eq.s32.totalorder %v3357_v6, %v3012_v13  ;;  %v881_v48 = vld [vmem:[%s224_s13] sm:$0xf] }
 0x138   : > { %v765_v53 = vadd.f32 %v733_v33, %v651_v20  ;;  %v845_v31 = vsel %vm805_vm8, %v2941_v40, 0.0  ;;  %1969 = vmatpush1.bf16.msra.mxu1 %v3432_v63  ;;  %2065 = vmatpush1.bf16.msra.mxu0 %v3432_v63  ;;  %v847_v34 = vsel %vm807_vm9, %v2941_v40, 0.0  ;;  %vm464_vm5 = vcmp.eq.s32.totalorder %v3363_v38, %v3012_v13 }
 0x139   : > { %vm576_vm10 = vcmp.eq.s32.totalorder %v3357_v6, %v3025_v24  ;;  %v877_v42 = vadd.f32 %v845_v31, %v763_v32  ;;  %v502_v39 = vsel %vm462_vm11, %v2996_v0, 0.0  ;;  %v504_v52 = vsel %vm464_vm5, %v2996_v0, 0.0 }
 0x13a   : > { %v879_v58 = vadd.f32 %v847_v34, %v765_v53  ;;  %vm578_vm14 = vcmp.eq.s32.totalorder %v3363_v38, %v3025_v24  ;;  %v616_v40 = vsel %vm576_vm10, %v3009_v14, 0.0  ;;  %vm690_vm0 = vcmp.eq.s32.totalorder %v3357_v6, %v3028_v25 }
 0x13b   : > { %vm692_vm12 = vcmp.eq.s32.totalorder %v3363_v38, %v3028_v25  ;;  %v938_v13 = vand.u32 4294901760, %v877_v42  ;;  %v618_v36 = vsel %vm578_vm14, %v3009_v14, 0.0  ;;  %v648_v35 = vadd.f32 %v616_v40, %v502_v39 }
 0x13c   : > { %v942_v18 = vand.u32 4294901760, %v879_v58  ;;  %v650_v15 = vadd.f32 %v618_v36, %v504_v52  ;;  %v730_v0 = vsel %vm690_vm0, %v3000_v9, 0.0  ;;  %v732_v44 = vsel %vm692_vm12, %v3000_v9, 0.0 }
 0x13d   : > { %vm804_vm13 = vcmp.eq.s32.totalorder %v3357_v6, %v3037_v30  ;;  %v3468_v4 = vsub.f32 %v877_v42, %v938_v13  ;;  %v762_v25 = vadd.f32 %v730_v0, %v648_v35  ;;  %vm806_vm15 = vcmp.eq.s32.totalorder %v3363_v38, %v3037_v30 }
 0x13e   : > { %v3466_v24 = vpack.c.bf16 %v942_v18, %v938_v13  ;;  %v3470_v61 = vsub.f32 %v879_v58, %v942_v18  ;;  %v764_v20 = vadd.f32 %v732_v44, %v650_v15  ;;  %v844_v14 = vsel %vm804_vm13, %v3004_v8, 0.0 }
 0x13f   : > { %v3795_v9 = vand.u32 4294901760, %v3016_v51  ;;  %v846_v6 = vsel %vm806_vm15, %v3004_v8, 0.0  ;;  %v876_v33 = vadd.f32 %v844_v14, %v762_v25  ;;  %v3796_v32 = vand.u32 4294901760, %v3018_v22 }
 0x140   : > { %3794 = vst [vmem:[#allocation34_spill] sm:$0xff] %v3466_v24  ;;  %1971 = vmatprep.subr.bf16.mxu1 %v3466_v24  ;;  %2067 = vmatprep.subr.bf16.mxu0 %v3466_v24  ;;  %v878_v34 = vadd.f32 %v846_v6, %v764_v20  ;;  %v3490_v58 = vand.u32 4294901760, %v881_v48  ;;  %v998_v39 = vand.u32 4294901760, %v3086_v16  ;;  %v1010_v8 = vand.u32 4294901760, %v3088_v17 }
 0x141   : > { %v993_v5 = vsub.f32 %v3016_v51, %v3795_v9  ;;  %v1005_v53 = vsub.f32 %v3018_v22, %v3796_v32  ;;  %v3797_v31 = vmov %v3795_v9  ;;  %v3798_v30 = vmov %v3796_v32 }
 0x142   : > { %v2070_v38 = vpack.c.bf16 %v3798_v30, %v3797_v31  ;;  %v940_v52 = vand.u32 4294901760, %v876_v33  ;;  %v1016_v13 = vand.u32 4294901760, %v3104_v49  ;;  %v944_v18 = vand.u32 4294901760, %v878_v34 }
 0x143   : > { %v994_v42 = vand.u32 4294901760, %v993_v5  ;;  %v1006_v40 = vand.u32 4294901760, %v1005_v53  ;;  %v3496_v36 = vsub.f32 %v881_v48, %v3490_v58  ;;  %v999_v35 = vsub.f32 %v3086_v16, %v998_v39 }
 0x144   : > { %v1028_v15 = vand.u32 4294901760, %v3111_v55  ;;  %v3500_v0 = vsub.f32 %v876_v33, %v940_v52  ;;  %v1011_v25 = vsub.f32 %v3088_v17, %v1010_v8  ;;  %v2072_v20 = vpack.c.bf16 %v1010_v8, %v998_v39 }
 0x145   : > { %3799 = vst [vmem:[#allocation35_spill] sm:$0xff] %v3496_v36  ;;  %v1974_v44 = vpack.c.bf16 %v1006_v40, %v994_v42  ;;  %v3503_v14 = vpack.c.bf16 %v944_v18, %v940_v52  ;;  %v3505_v9 = vsub.f32 %v878_v34, %v944_v18  ;;  %v981_v5 = vand.u32 4294901760, %v3496_v36 }
 0x146   : > { %v1000_v6 = vand.u32 4294901760, %v999_v35  ;;  %v1012_v32 = vand.u32 4294901760, %v1011_v25  ;;  %v1017_v48 = vsub.f32 %v3104_v49, %v1016_v13  ;;  %v1029_v53 = vsub.f32 %v3111_v55, %v1028_v15 }
 0x147   : > { %3800 = vst [vmem:[#allocation36_spill] sm:$0xff] %v3503_v14  ;;  %v2074_v31 = vpack.c.bf16 %v1028_v15, %v1016_v13  ;;  %1973 = vmatpush1.bf16.msra.mxu1 %v3503_v14  ;;  %2069 = vmatpush1.bf16.msra.mxu0 %v3503_v14  ;;  %v982_v33 = vsub.f32 %v3496_v36, %v981_v5  ;;  %v1022_v30 = vand.u32 4294901760, %v3144_v19  ;;  %v1034_v34 = vand.u32 4294901760, %v3146_v23 }
 0x148   : > { %v1040_v42 = vand.u32 4294901760, %v3170_v59  ;;  %1975 = vmatprep.subr.bf16.mxu1 %v1974_v44  ;;  %2071 = vmatprep.subr.bf16.mxu0 %v2070_v38  ;;  %v1976_v39 = vpack.c.bf16 %v1012_v32, %v1000_v6  ;;  %v1018_v52 = vand.u32 4294901760, %v1017_v48  ;;  %v1030_v40 = vand.u32 4294901760, %v1029_v53 }
 0x149   : > { %v1052_v8 = vand.u32 4294901760, %v3178_v62  ;;  %v983_v13 = vand.u32 4294901760, %v982_v33  ;;  %v1023_v18 = vsub.f32 %v3144_v19, %v1022_v30  ;;  %v1035_v35 = vsub.f32 %v3146_v23, %v1034_v34 }
 0x14a   : > { %v2076_v15 = vpack.c.bf16 %v1034_v34, %v1022_v30  ;;  %1459 = vmatmul.mubr.f32.vlgmr.msra.gmra.mrb[0].mxu0 %v981_v5  ;;  %v1978_v25 = vpack.c.bf16 %v1030_v40, %v1018_v52  ;;  %v1041_v36 = vsub.f32 %v3170_v59, %v1040_v42  ;;  %v1046_v6 = vand.u32 4294901760, %v3201_v47 }
 0x14b   : > { %v1053_v14 = vsub.f32 %v3178_v62, %v1052_v8  ;;  %v2078_v24 = vpack.c.bf16 %v1052_v8, %v1040_v42  ;;  %984 = vmatmul.mubr.f32.vlgmr.msra.gmra.mrb[0].mxu1 %v983_v13  ;;  %2073 = vmatpush1.bf16.msra.mxu0 %v2072_v20  ;;  %v1024_v38 = vand.u32 4294901760, %v1023_v18  ;;  %v1036_v44 = vand.u32 4294901760, %v1035_v35 }
 0x14c   : > { %v1058_v32 = vand.u32 4294901760, %v3209_v56  ;;  %1977 = vmatpush1.bf16.msra.mxu1 %v1976_v39  ;;  %2075 = vmatprep.subr.bf16.mxu0 %v2074_v31  ;;  %v1042_v48 = vand.u32 4294901760, %v1041_v36  ;;  %v1064_v5 = vand.u32 4294901760, %v3230_v27  ;;  %v1076_v33 = vand.u32 4294901760, %v3238_v41 }
 0x14d   : > { %v1054_v53 = vand.u32 4294901760, %v1053_v14  ;;  %1979 = vmatprep.subr.bf16.mxu1 %v1978_v25  ;;  %v1980_v30 = vpack.c.bf16 %v1036_v44, %v1024_v38  ;;  %v1047_v34 = vsub.f32 %v3201_v47, %v1046_v6  ;;  %v3801_v31 = vmov 0.0  }
 0x14e   : > { %v1059_v20 = vsub.f32 %v3209_v56, %v1058_v32  ;;  %v2080_v42 = vpack.c.bf16 %v1058_v32, %v1046_v6  ;;  %v1065_v40 = vsub.f32 %v3230_v27, %v1064_v5  ;;  %v1077_v8 = vsub.f32 %v3238_v41, %v1076_v33  ;;  %1214 = vmatprep.mubr.f32.mxu1 %v3801_v31 }
 0x14f   : > { %v1982_v52 = vpack.c.bf16 %v1054_v53, %v1042_v48  ;;  %v2082_v39 = vpack.c.bf16 %v1076_v33, %v1064_v5  ;;  %2077 = vmatpush1.bf16.msra.mxu0 %v2076_v15  ;;  %v1048_v36 = vand.u32 4294901760, %v1047_v34  ;;  %v1070_v13 = vand.u32 4294901760, %v3260_v43  ;;  %1625 = vmatprep.mubr.f32.mxu0 %v3801_v31 }
 0x150   : > { %v1060_v14 = vand.u32 4294901760, %v1059_v20  ;;  %v1082_v18 = vand.u32 4294901760, %v3262_v37  ;;  %1981 = vmatpush1.bf16.msra.mxu1 %v1980_v30  ;;  %2079 = vmatprep.subr.bf16.mxu0 %v2078_v24  ;;  %v1066_v35 = vand.u32 4294901760, %v1065_v40  ;;  %v1078_v25 = vand.u32 4294901760, %v1077_v8 }
 0x151   : > { %v1088_v38 = vand.u32 4294901760, %v3287_v57  ;;  %v1100_v44 = vand.u32 4294901760, %v3295_v1  ;;  %1983 = vmatprep.subr.bf16.mxu1 %v1982_v52  ;;  %v1071_v15 = vsub.f32 %v3260_v43, %v1070_v13  ;;  %v1094_v20 = vand.u32 4294901760, %v3309_v2 }
 0x152   : > { %v1984_v6 = vpack.c.bf16 %v1060_v14, %v1048_v36  ;;  %v1083_v32 = vsub.f32 %v3262_v37, %v1082_v18  ;;  %v2084_v48 = vpack.c.bf16 %v1082_v18, %v1070_v13  ;;  %v1986_v53 = vpack.c.bf16 %v1078_v25, %v1066_v35 }
 0x153   : > { %v1089_v5 = vsub.f32 %v3287_v57, %v1088_v38  ;;  %v1101_v33 = vsub.f32 %v3295_v1, %v1100_v44  ;;  %v2086_v30 = vpack.c.bf16 %v1100_v44, %v1088_v38  ;;  %2081 = vmatpush1.bf16.msra.mxu0 %v2080_v42  ;;  %v1072_v24 = vand.u32 4294901760, %v1071_v15 }
 0x154   : > { %v1084_v34 = vand.u32 4294901760, %v1083_v32  ;;  %v1106_v40 = vand.u32 4294901760, %v3314_v46  ;;  %1985 = vmatpush1.bf16.msra.mxu1 %v1984_v6  ;;  %2083 = vmatprep.subr.bf16.mxu0 %v2082_v39  ;;  %v1112_v36 = vand.u32 4294901760, %v3340_v26  ;;  %v1124_v14 = vand.u32 4294901760, %v3342_v29 }
 0x155   : > { %v1090_v52 = vand.u32 4294901760, %v1089_v5  ;;  %v1102_v8 = vand.u32 4294901760, %v1101_v33  ;;  %1987 = vmatprep.subr.bf16.mxu1 %v1986_v53  ;;  %v1095_v18 = vsub.f32 %v3309_v2, %v1094_v20  ;;  %v1118_v32 = vand.u32 4294901760, %v3372_v45 }
 0x156   : > { %v1988_v13 = vpack.c.bf16 %v1084_v34, %v1072_v24  ;;  %v1107_v42 = vsub.f32 %v3314_v46, %v1106_v40  ;;  %v2088_v35 = vpack.c.bf16 %v1106_v40, %v1094_v20  ;;  %v1113_v38 = vsub.f32 %v3340_v26, %v1112_v36 }
 0x157   : > { %v1990_v25 = vpack.c.bf16 %v1102_v8, %v1090_v52  ;;  %v1125_v44 = vsub.f32 %v3342_v29, %v1124_v14  ;;  %v2090_v6 = vpack.c.bf16 %v1124_v14, %v1112_v36  ;;  %2085 = vmatpush1.bf16.msra.mxu0 %v2084_v48  ;;  %v1096_v39 = vand.u32 4294901760, %v1095_v18 }
 0x158   : > { %v1108_v15 = vand.u32 4294901760, %v1107_v42  ;;  %v1130_v5 = vand.u32 4294901760, %v3374_v7  ;;  %1989 = vmatpush1.bf16.msra.mxu1 %v1988_v13  ;;  %2087 = vmatprep.subr.bf16.mxu0 %v2086_v30  ;;  %v1114_v53 = vand.u32 4294901760, %v1113_v38  ;;  %v1136_v24 = vand.u32 4294901760, %v3406_v11 }
 0x159   : > { %v1126_v33 = vand.u32 4294901760, %v1125_v44  ;;  %v1148_v34 = vand.u32 4294901760, %v3408_v60  ;;  %1991 = vmatprep.subr.bf16.mxu1 %v1990_v25  ;;  %v1119_v40 = vsub.f32 %v3372_v45, %v1118_v32  ;;  %v1142_v42 = vand.u32 4294901760, %v3434_v28 }
 0x15a   : > { %v1992_v20 = vpack.c.bf16 %v1108_v15, %v1096_v39  ;;  %v1131_v48 = vsub.f32 %v3374_v7, %v1130_v5  ;;  %v2092_v52 = vpack.c.bf16 %v1130_v5, %v1118_v32  ;;  %v1137_v36 = vsub.f32 %v3406_v11, %v1136_v24 }
 0x15b   : > { %v1994_v8 = vpack.c.bf16 %v1126_v33, %v1114_v53  ;;  %v1149_v14 = vsub.f32 %v3408_v60, %v1148_v34  ;;  %v2094_v13 = vpack.c.bf16 %v1148_v34, %v1136_v24  ;;  %2089 = vmatpush1.bf16.msra.mxu0 %v2088_v35  ;;  %v1120_v30 = vand.u32 4294901760, %v1119_v40 }
 0x15c   : > { %v1132_v18 = vand.u32 4294901760, %v1131_v48  ;;  %v1154_v38 = vand.u32 4294901760, %v3436_v3  ;;  %1993 = vmatpush1.bf16.msra.mxu1 %v1992_v20  ;;  %2091 = vmatprep.subr.bf16.mxu0 %v2090_v6  ;;  %v1138_v25 = vand.u32 4294901760, %v1137_v36  ;;  %v1160_v39 = vand.u32 4294901760, %v3468_v4 }
 0x15d   : > { %v1150_v44 = vand.u32 4294901760, %v1149_v14  ;;  %v1172_v15 = vand.u32 4294901760, %v3470_v61  ;;  %1995 = vmatprep.subr.bf16.mxu1 %v1994_v8  ;;  %v1143_v5 = vsub.f32 %v3434_v28, %v1142_v42  ;;  %v1166_v48 = vand.u32 4294901760, %v3500_v0 }
 0x15e   : > { %v1996_v32 = vpack.c.bf16 %v1132_v18, %v1120_v30  ;;  %v1155_v35 = vsub.f32 %v3436_v3, %v1154_v38  ;;  %v2096_v53 = vpack.c.bf16 %v1154_v38, %v1142_v42  ;;  %v1161_v24 = vsub.f32 %v3468_v4, %v1160_v39 }
 0x15f   : > { %v1998_v33 = vpack.c.bf16 %v1150_v44, %v1138_v25  ;;  %v1173_v34 = vsub.f32 %v3470_v61, %v1172_v15  ;;  %v2098_v20 = vpack.c.bf16 %v1172_v15, %v1160_v39  ;;  %2093 = vmatpush1.bf16.msra.mxu0 %v2092_v52  ;;  %v1144_v6 = vand.u32 4294901760, %v1143_v5 }
 0x160   : > { %v1156_v40 = vand.u32 4294901760, %v1155_v35  ;;  %v1178_v36 = vand.u32 4294901760, %v3505_v9  ;;  %1997 = vmatpush1.bf16.msra.mxu1 %v1996_v32  ;;  %2095 = vmatprep.subr.bf16.mxu0 %v2094_v13  ;;  %v1162_v8 = vand.u32 4294901760, %v1161_v24  ;;  %v2006_v30 = vpack.c.bf16 %v3018_v22, %v3016_v51  ;;  %v3815_v35 = vld [vmem:[#allocation23_spill] sm:$0xff] (!%p1931_p3) }
 0x161   : > { %v1174_v14 = vand.u32 4294901760, %v1173_v34  ;;  %v2008_v18 = vpack.c.bf16 %v3088_v17, %v3086_v16  ;;  %1999 = vmatprep.subr.bf16.mxu1 %v1998_v33  ;;  %v1167_v52 = vsub.f32 %v3500_v0, %v1166_v48  ;;  %v2010_v39 = vpack.c.bf16 %v3111_v55, %v3104_v49 }
 0x162   : > { %v2000_v42 = vpack.c.bf16 %v1156_v40, %v1144_v6  ;;  %v1179_v38 = vsub.f32 %v3505_v9, %v1178_v36  ;;  %v2100_v25 = vpack.c.bf16 %v1178_v36, %v1166_v48  ;;  %v2012_v13 = vpack.c.bf16 %v3146_v23, %v3144_v19  ;;  %v3802_v19 = vld [vmem:[#allocation26_spill] sm:$0xff]  ;;  %v3804_v23 = vld [vmem:[#allocation28_spill] sm:$0xff] }
 0x163   : > { %v2002_v44 = vpack.c.bf16 %v1174_v14, %v1162_v8  ;;  %v2014_v51 = vpack.c.bf16 %v3178_v62, %v3170_v59  ;;  %2097 = vmatpush1.bf16.msra.mxu0 %v2096_v53  ;;  %v1168_v22 = vand.u32 4294901760, %v1167_v52  ;;  %v2016_v17 = vpack.c.bf16 %v3209_v56, %v3201_v47  ;;  %v3806_v59 = vld [vmem:[#allocation30_spill] sm:$0xff]  ;;  %v3807_v47 = vld [vmem:[#allocation31_spill] sm:$0xff]  ;;  %v3808_v56 = vld [vmem:[#allocation32_spill] sm:$0xff] }
 0x164   : > { %v1180_v16 = vand.u32 4294901760, %v1179_v38  ;;  %v2018_v15 = vpack.c.bf16 %v3238_v41, %v3230_v27  ;;  %2001 = vmatpush1.bf16.msra.mxu1 %v2000_v42  ;;  %2099 = vmatprep.subr.bf16.mxu0 %v2098_v20  ;;  %v2020_v49 = vpack.c.bf16 %v3262_v37, %v3260_v43  ;;  %v2026_v62 = vpack.c.bf16 %v3342_v29, %v3340_v26  ;;  %v3809_v43 = vld [vmem:[#allocation33_spill] sm:$0xff]  ;;  %v3811_v29 = vld [vmem:[#allocation36_spill] sm:$0xff] }
 0x165   : > { %2003 = vmatprep.subr.bf16.mxu1 %v2002_v44  ;;  %v2028_v27 = vpack.c.bf16 %v3374_v7, %v3372_v45  ;;  %v2030_v41 = vpack.c.bf16 %v3408_v60, %v3406_v11  ;;  %v2032_v37 = vpack.c.bf16 %v3436_v3, %v3434_v28 }
 0x166   : > { %v2004_v55 = vpack.c.bf16 %v1180_v16, %v1168_v22 }
 0x167   : > { %2101 = vmatpush1.bf16.msra.mxu0 %v2100_v25 }
 0x168   : > { %2005 = vmatpush1.bf16.msra.mxu1 %v2004_v55  ;;  %2103 = vmatprep.subr.bf16.mxu0 %v3014_v21  ;;  %v3803_v21 = vld [vmem:[#allocation27_spill] sm:$0xff] }
 0x169   : > { %2007 = vmatprep.subr.bf16.mxu1 %v2006_v30 }
 0x16a   : > { %1627 = vmatmul.mubr.f32.vlgmr.msra.gmra.mrb[0].mxu0 %v3490_v58 }
 0x16b   : > { %1216 = vmatmul.mubr.f32.vlgmr.msra.gmra.mrb[0].mxu1 %v3490_v58  ;;  %2105 = vmatpush1.bf16.msra.mxu0 %v3084_v12  ;;  %v2022_v12 = vpack.c.bf16 %v3295_v1, %v3287_v57  ;;  %v2034_v57 = vpack.c.bf16 %v3470_v61, %v3468_v4  ;;  %v3810_v1 = vld [vmem:[#allocation34_spill] sm:$0xff]  ;;  %v3813_v4 = vld [vmem:[#allocation25_spill] sm:$0xff] (!%p1931_p3)  ;;  %v3814_v61 = vld [vmem:[#allocation24_spill] sm:$0xff] (!%p1931_p3) }
 0x16c   : > { %2009 = vmatpush1.bf16.msra.mxu1 %v2008_v18  ;;  %2107 = vmatprep.subr.bf16.mxu0 %v3109_v54  ;;  %v3805_v54 = vld [vmem:[#allocation29_spill] sm:$0xff]  ;;  %vm1747_vm1 = vcmp.ge.f32.partialorder (!%p1931_p3), %v3813_v4, 0.9999  ;;  %vm1748_vm2 = vcmp.ge.f32.partialorder (!%p1931_p3), %v3814_v61, 0.9999 }
 0x16d   : > { %2011 = vmatprep.subr.bf16.mxu1 %v2010_v39  ;;  %1350 = vmatprep.mubr.f32.mxu1 %v3801_v31 }
 0x16e   : > { %1729 = vmatprep.mubr.f32.mxu0 %v3801_v31 }
 0x16f   : > { %2109 = vmatpush1.bf16.msra.mxu0 %v3142_v10  ;;  %v2024_v10 = vpack.c.bf16 %v3314_v46, %v3309_v2  ;;  %v2036_v2 = vpack.c.bf16 %v3505_v9, %v3500_v0  ;;  %v3812_v46 = vld [vmem:[#allocation35_spill] sm:$0xff]  ;;  %v2490_v0 = vmov (!%p1931_p3), 0.0  }
 0x170   : > { %2013 = vmatpush1.bf16.msra.mxu1 %v2012_v13  ;;  %2111 = vmatprep.subr.bf16.mxu0 %v3802_v19  ;;  %v1932_v9 = vsel (!%p1931_p3), %vm1747_vm1, 1.0, %v2490_v0  ;;  %v1933_v31 = vsel (!%p1931_p3), %vm1748_vm2, 1.0, %v2490_v0 }
 0x171   : > { %2015 = vmatprep.subr.bf16.mxu1 %v2014_v51  ;;  %v1759_v53 = vrot.slane (!%p1931_p3), %v1932_v9, %v3815_v35  ;;  %v1763_v33 = vrot.slane (!%p1931_p3), %v1933_v31, %v3815_v35 }
 0x173   : > { %2113 = vmatpush1.bf16.msra.mxu0 %v3803_v21  ;;  %v1766_v24 = vcombine.low (!%p1931_p3), %v1759_v53, %v1763_v33 }
 0x174   : > { %2017 = vmatpush1.bf16.msra.mxu1 %v2016_v17  ;;  %2115 = vmatprep.subr.bf16.mxu0 %v3804_v23 }
 0x175   : > { %2019 = vmatprep.subr.bf16.mxu1 %v2018_v15 }
 0x177   : > { %2117 = vmatpush1.bf16.msra.mxu0 %v3805_v54 }
 0x178   : > { %2021 = vmatpush1.bf16.msra.mxu1 %v2020_v49  ;;  %2119 = vmatprep.subr.bf16.mxu0 %v3806_v59 }
 0x179   : > { %2023 = vmatprep.subr.bf16.mxu1 %v2022_v12 }
 0x17b   : > { %2121 = vmatpush1.bf16.msra.mxu0 %v3807_v47 }
 0x17c   : > { %2025 = vmatpush1.bf16.msra.mxu1 %v2024_v10  ;;  %2123 = vmatprep.subr.bf16.mxu0 %v3808_v56 }
 0x17d   : > { %2027 = vmatprep.subr.bf16.mxu1 %v2026_v62 }
 0x17f   : > { %2125 = vmatpush1.bf16.msra.mxu0 %v3809_v43 }
 0x180   : > { %2029 = vmatpush1.bf16.msra.mxu1 %v2028_v27  ;;  %2127 = vmatprep.subr.bf16.mxu0 %v3404_v50 }
 0x181   : > { %2031 = vmatprep.subr.bf16.mxu1 %v2030_v41 }
 0x183   : > { %2129 = vmatpush1.bf16.msra.mxu0 %v3432_v63  ;;  %v880_v63 = vld [vmem:[#allocation2] sm:$0xff] }
 0x184   : > { %2033 = vmatpush1.bf16.msra.mxu1 %v2032_v37  ;;  %2131 = vmatprep.subr.bf16.mxu0 %v3810_v1 }
 0x185   : > { %2035 = vmatprep.subr.bf16.mxu1 %v2034_v57 }
 0x187   : > { %2133 = vmatpush1.bf16.msra.mxu0 %v3811_v29 }
 0x188   : > { %2037 = vmatpush1.bf16.msra.mxu1 %v2036_v2 }
 0x18a   : > { %1731 = vmatmul.mubr.f32.vlgmr.msra.gmra.mrb[0].mxu0 %v3490_v58  ;;  %v1753_v58 = vld [vmem:[%s2780_s11] sm:$0xff] (!%p1931_p3) }
 0x18b   : > { %1353 = vmatmul.mubr.f32.vlgmr.msra.gmra.mrb[0].mxu1 %v3812_v46 }
 0x25d   : > { %v1732_v26 = vpop.f32.mrb[0].mxu0 }
 0x25e   : > { %v1354_v45 = vpop.f32.mrb[0].mxu1  ;;  %v1734_v7 = vpop.f32.mrb[1].mxu0 }
 0x25f   : > { %v2134_v50 = vadd.f32 %v1732_v26, %v1354_v45  ;;  %v1356_v11 = vpop.f32.mrb[1].mxu1 }
 0x260   : > { %v2135_v60 = vadd.f32 %v1734_v7, %v1356_v11  ;;  %1746 = sbr.rel (%p1931_p3) target bundleno = 627 (0x273), region = 52 }
 0x262   : > { %v1739_v28 = vcombine.low %v2134_v50, %v2135_v60 }
 0x264   : > { %v1741_v3 = vadd.f32 %v1739_v28, %v880_v63 }
 0x266   : > { %1742 = vst [vmem:[#allocation2] sm:$0xff] %v1741_v3 }
 0x26d   : > { %v1754_v32 = vld [vmem:[#allocation2] sm:$0xff] }
 0x26e   : > { %v1755_v5 = vsub.f32 %v1753_v58, %v1754_v32 }
 0x270   : > { %v1768_v34 = vmul.f32 %v1766_v24, %v1755_v5 }
 0x272   : > { %1769 = vst [vmem:[%s2787_s25] sm:$0xff] %v1768_v34 }
 0x273 PF: > { %s3816_s26 = sld [smem:[#allocation16_spill]]  ;;  %s3817_s29 = sld [smem:[#allocation19_spill]] }
 0x274   : > { %s3818_s13 = sld [smem:[#allocation38_spill]]  ;;  %s1785_s9 = sshll.u32 %s2787_s25, 4  ;;  %s1786_s9 = int_to_ptr.vmem [resolvable:$true] %s1785_s9 }
 0x275   : > { %s1771_s6 = scalar_lea.sflag [#allocation5], %s2777_s5  ;;  %s2357_s7 = scalar_lea.vmem %s1786_s9, 128 }
 0x276   : > { %p2358_p12 = scmp.ne.s32.totalorder %s1786_s9, %s2357_s7  ;;  %s2491_s23 = smov [#allocation9]  }
 0x277   : > { %s2361_s11 = sshll.u32 %s2491_s23, 4  ;;  %s2362_s11 = int_to_ptr.vmem [resolvable:$false] %s2361_s11 }
 0x278   : > { %s2363_s1 = scalar_lea.vmem %s2362_s11, 256  ;;  %p2364_p7 = scmp.lt.s32.totalorder %s1786_s9, %s2362_s11 }
 0x279   : > { %s1941_s15 = sshll.u32 %s3816_s26, 7  ;;  %p3820_p6 = scmp.ne.s32.totalorder %s3817_s29, 0 }
 0x27a   : > { %s3819_s24 = smov %s3818_s13  ;;  %s3632_s19 = scalar_lea.hbm %s3818_s13, %s1941_s15 }
 0x27b   : > { %p2359_p0 = pnand %p2358_p12, %p3820_p6  ;;  %p2365_p2 = scmp.lt.s32.totalorder %s2363_s1, %s2357_s7 }
 0x27d   : > { %p2360_p8 = pneg %p2359_p0  ;;  %p2366_p13 = por %p2365_p2, %p2364_p7 }
 0x27f   : > { %p2367_p1 = pnand %p2366_p13, %p2360_p8 }
 0x281   : > { %2370 = shalt.err (!%p2367_p1)
}
 0x282   : > { %s2371_s5 = scalar_lea.hbm %s3632_s19, 128  ;;  %s2375_s27 = scalar_lea.hbm %s3819_s24, 256 }
 0x283   : > { %p2372_p5 = scmp.ne.s32.totalorder %s3632_s19, %s2371_s5  ;;  %p2376_p11 = scmp.lt.u32.totalorder %s3632_s19, %s3819_s24 }
 0x284   : > { %p2377_p4 = scmp.lt.u32.totalorder %s2375_s27, %s2371_s5  ;;  %p2379_p12 = scmp.lt.u32.totalorder %s2371_s5, %s3632_s19 }
 0x285   : > { %p2373_p9 = pnand %p2372_p5, %p3820_p6 }
 0x286   : > { %p2378_p3 = por %p2377_p4, %p2376_p11 }
 0x287   : > { %p2374_p10 = pneg %p2373_p9 }
 0x288   : > { %p2380_p0 = por %p2379_p12, %p2378_p3 }
 0x28a   : > { %p2381_p8 = pnand %p2380_p0, %p2374_p10 }
 0x28c   : > { %2384 = shalt.err (!%p2381_p8)
}
 0x28d   : > { %2158 = dma.vmem_to_hbm [thread:$0]  (%p3820_p6), %s1786_s9, 128, %s3632_s19, %s1771_s6  }
 0x28e PF: > { %s3821_s26 = sld [smem:[#allocation13_spill]]  ;;  %s3822_s15 = sld [smem:[#allocation20_spill]] }
 0x28f   : > { %p2175_p7 = scmp.ge.s32.totalorder %s2483_s22, 2 }
 0x294   : > { %s1797_s12 = sand.u32 1, %s3821_s26   ;;  %p3823_p2 = scmp.ne.s32.totalorder %s3822_s15, 0 }
 0x295   : > { %s1798_s18 = scalar_lea.sflag [#allocation5], %s1797_s12 }
 0x296   : > { %p2171_p13 = pnand %p2175_p7, %p3823_p2 }
 0x298   : > { %2438 = dma.done.wait (!%p2171_p13), %s1798_s18, 128  }
 0x299   : > { %2440 = vsyncadd (!%p2171_p13), %s1798_s18, 4294967168  ;;  %s22_s22 = sadd.s32 1, %s2483_s22   ;;  %s3824_s12 = sld [smem:[#allocation14_spill]] }
 0x29a   : > { %p19_p1 = scmp.ge.s32.totalorder %s22_s22, 6   ;;  %s3825_s29 = sld [smem:[#allocation21_spill]] }
 0x29b   : > { %s3826_s13 = smov %s2451_s14  ;;  %s3827_s14 = smov %s2690_s3 }
 0x29c   : > { %s3828_s15 = smov %s2459_s16  ;;  %s3829_s16 = smov %s2463_s17 }
 0x29d   : > { %s3830_s17 = smov %s2693_s28  ;;  %s3831_s18 = smov %s2475_s20 }
 0x29e   : > { %s3832_s19 = smov %s2479_s21  ;;  %s3834_s21 = smov %s3840_s8 }
 0x29f   :  { %21 = sbr.rel (!%p19_p1) target bundleno = 14 (0xe), region = 109 }
 0x2a0   : > { %s3833_s20 = smov %s3825_s29 }
 0x2a6   :  { %1803 = vsyncpa [#allocation4], 1 }
 0x2a7   :  { %1805 = vsyncpa [#allocation4 + $0x1], 1 }
 0x2a8   :  { %1806 = vsyncpa [#allocation7], 1 }
 0x2a9   :  { %1808 = vsyncpa [#allocation7 + $0x1], 1 }
 0x2aa   :  { %1809 = vsyncpa [#allocation5], 1 }
 0x2ab   :  { %1811 = vsyncpa [#allocation5 + $0x1], 1 }

</bundles_post_ra>
